<compile_context>
chip_gen: v5e
topology: v5e:2x2
jax: 0.10.0
libtpu: 0.0.40
codegen_flags: <defaults>
</compile_context>

<pallas_src>
import math

import jax
import jax.numpy as jnp
from jax.experimental import pallas as pl
from jax.experimental.pallas import tpu as pltpu


def _largest_divisor_leq(n, cap):
    d = max(1, min(n, cap))
    while n % d != 0:
        d -= 1
    return d


def _pick_tile(n, preferred, align):
    """Largest multiple-of-`align` divisor of n that is <= preferred; fall back to n (full dim)."""
    t = (min(n, preferred) // align) * align
    while t >= align:
        if n % t == 0:
            return t
        t -= align
    return n


def _vmem_resident():
    # Whole-array, single-buffer VMEM residency for loop-invariant operands (no double-buffering).
    return pl.BlockSpec(memory_space=pltpu.MemorySpace.VMEM)


# -----------------------------------------------------------------------------
# LSTM layer kernel.
# Grid iterates over time-chunks (sequential recurrence, "arbitrary"); h/c live in f32 VMEM
# scratch and persist across grid iterations.  PyTorch gate order: i, f, g, o.
#
#   x2d_ref : (Tc*B, Din)  bf16  time-chunk of inputs, time-major rows
#   h0/c0   : (B, H)       f32   initial state             (VMEM-resident)
#   wih_ref : (Din, 4H)    bf16  input-projection weight   (VMEM-resident)
#   whh_ref : (H, 4H)      bf16  recurrent weight          (VMEM-resident)
#   b_ref   : (1, 4H)      f32   combined bias b_ih + b_hh (VMEM-resident)
#   y_ref   : (Tc, B, H)   bf16  per-step hidden outputs for this chunk
#   hT/cT   : (B, H)       f32   final state (written on last chunk only)
# -----------------------------------------------------------------------------
def lstm_layer_kernel(x2d_ref, h0_ref, c0_ref, wih_ref, whh_ref, b_ref,
                      y_ref, hT_ref, cT_ref, h_scr, c_scr, gx_scr):
    t = pl.program_id(0)

    @pl.when(t == 0)
    def _():
        h_scr[...] = h0_ref[...]
        c_scr[...] = c0_ref[...]

    Tc, B, H = y_ref.shape

    # Hoisted input projection for the whole chunk: one (Tc*B, Din) @ (Din, 4H) MXU matmul,
    # f32 accumulation, result staged in VMEM scratch for the sequential loop below.
    gx_scr[...] = (jnp.dot(x2d_ref[...], wih_ref[...],
                           preferred_element_type=jnp.float32)
                   + b_ref[...])                                   # (Tc*B, 4H) f32

    @pl.loop(0, Tc)
    def _(i):
        h = h_scr[...]                                             # (B, H) f32
        c = c_scr[...]                                             # (B, H) f32
        row = pl.multiple_of(i * B, B)
        gates = (gx_scr[pl.ds(row, B), :]
                 + jnp.dot(h.astype(jnp.bfloat16), whh_ref[...],
                           preferred_element_type=jnp.float32))    # (B, 4H) f32
        i_g = jax.nn.sigmoid(gates[:, 0 * H:1 * H])
        f_g = jax.nn.sigmoid(gates[:, 1 * H:2 * H])
        g_g = jnp.tanh(gates[:, 2 * H:3 * H])
        o_g = jax.nn.sigmoid(gates[:, 3 * H:4 * H])
        c_new = f_g * c + i_g * g_g
        h_new = o_g * jnp.tanh(c_new)
        h_scr[...] = h_new
        c_scr[...] = c_new
        y_ref[i] = h_new.astype(y_ref.dtype)

    @pl.when(t == pl.num_programs(0) - 1)
    def _():
        hT_ref[...] = h_scr[...]
        cT_ref[...] = c_scr[...]


def lstm_layer(x, h0, c0, wih_t, whh_t, b, *, time_chunk=8):
    """x: (T, B, Din) bf16; h0/c0: (B, H) f32; wih_t: (Din, 4H) bf16; whh_t: (H, 4H) bf16;
    b: (1, 4H) f32.  Returns y: (T, B, H) bf16, h_T: (B, H) f32, c_T: (B, H) f32."""
    T, B, Din = x.shape
    H = h0.shape[-1]
    Tc = _largest_divisor_leq(T, time_chunk)
    x2d = x.reshape(T * B, Din)   # free metadata reshape in HBM; gives dense matmul rows

    return pl.pallas_call(
        lstm_layer_kernel,
        out_shape=(
            jax.ShapeDtypeStruct((T, B, H), jnp.bfloat16),   # per-step outputs
            jax.ShapeDtypeStruct((B, H), jnp.float32),       # h_T
            jax.ShapeDtypeStruct((B, H), jnp.float32),       # c_T
        ),
        grid_spec=pltpu.PrefetchScalarGridSpec(
            num_scalar_prefetch=0,
            grid=(T // Tc,),
            in_specs=[
                pl.BlockSpec((Tc * B, Din), lambda t: (t, 0)),   # time-chunk of inputs
                _vmem_resident(),   # h0
                _vmem_resident(),   # c0
                _vmem_resident(),   # wih_t (loop-invariant)
                _vmem_resident(),   # whh_t (loop-invariant)
                _vmem_resident(),   # bias  (loop-invariant)
            ],
            out_specs=[
                pl.BlockSpec((Tc, B, H), lambda t: (t, 0, 0)),
                pl.BlockSpec((B, H), lambda t: (0, 0)),
                pl.BlockSpec((B, H), lambda t: (0, 0)),
            ],
            scratch_shapes=[
                pltpu.VMEM((B, H), jnp.float32),           # h state (persists across chunks)
                pltpu.VMEM((B, H), jnp.float32),           # c state
                pltpu.VMEM((Tc * B, 4 * H), jnp.float32),  # chunk input-projection gates
            ],
        ),
        compiler_params=pltpu.CompilerParams(
            dimension_semantics=("arbitrary",),            # sequential recurrence
            vmem_limit_bytes=48 * 1024 * 1024,
        ),
    )(x2d, h0, c0, wih_t, whh_t, b)


# -----------------------------------------------------------------------------
# Decoder (Linear) kernel: tiled (T*B, H) @ (H, V) + bias, parallel grid over rows x vocab.
# -----------------------------------------------------------------------------
def decoder_kernel(o_ref, w_ref, b_ref, d_ref):
    d_ref[...] = (jnp.dot(o_ref[...], w_ref[...], preferred_element_type=jnp.float32)
                  + b_ref[...])


def decoder(o2d, dec_w_t, dec_b):
    """o2d: (T*B, H) bf16; dec_w_t: (H, V) bf16; dec_b: (1, V) f32 -> (T*B, V) f32 logits."""
    TB, H = o2d.shape
    V = dec_w_t.shape[-1]
    tm = _pick_tile(TB, 256, 8)      # rows per tile (merged T*B)
    tn = _pick_tile(V, 1024, 128)    # vocab columns per tile (lane-dense output stores)

    cost = pl.CostEstimate(
        flops=2 * TB * V * H,
        transcendentals=0,
        bytes_accessed=(o2d.size * o2d.dtype.itemsize
                        + dec_w_t.size * dec_w_t.dtype.itemsize
                        + dec_b.size * dec_b.dtype.itemsize
                        + TB * V * 4),
    )

    return pl.pallas_call(
        decoder_kernel,
        out_shape=jax.ShapeDtypeStruct((TB, V), jnp.float32),
        grid_spec=pltpu.PrefetchScalarGridSpec(
            num_scalar_prefetch=0,
            grid=(TB // tm, V // tn),
            in_specs=[
                pl.BlockSpec((tm, H), lambda i, j: (i, 0)),
                pl.BlockSpec((H, tn), lambda i, j: (0, j)),
                pl.BlockSpec((1, tn), lambda i, j: (0, j)),
            ],
            out_specs=pl.BlockSpec((tm, tn), lambda i, j: (i, j)),
        ),
        compiler_params=pltpu.CompilerParams(
            dimension_semantics=("parallel", "parallel"),
            vmem_limit_bytes=48 * 1024 * 1024,
        ),
        cost_estimate=cost,
    )(o2d, dec_w_t, dec_b)


# -----------------------------------------------------------------------------
# Full RNNLM forward (eval mode, no sequence packing).
# -----------------------------------------------------------------------------
def rnnlm_forward(tokens, hidden, params, *, time_chunk=8):
    h0_all, c0_all = hidden                            # (L, B, H) each, f32
    e = params["emb"][tokens].astype(jnp.bfloat16)     # (T, B, ninp)  embedding gather (glue)
    # dropout = identity (eval mode)

    x = e
    h_list, c_list = [], []
    for l in range(len(params["wih_t"])):
        y, hT, cT = lstm_layer(
            x, h0_all[l], c0_all[l],
            params["wih_t"][l], params["whh_t"][l], params["b"][l],
            time_chunk=time_chunk,
        )
        x = y                                          # (T, B, H) bf16
        h_list.append(hT)
        c_list.append(cT)

    T, B, H = x.shape
    d = decoder(x.reshape(T * B, H), params["dec_w_t"], params["dec_b"])
    d = d.reshape(T, B, -1)                            # (T, B, ntoken) f32 logits
    return d, (jnp.stack(h_list), jnp.stack(c_list))


# -----------------------------------------------------------------------------
# Deterministic parameter init (mirrors shapes of torch.nn.Embedding / LSTM / Linear).
# Matmul operands stored in bf16 (f32 accumulation in-kernel); biases / state in f32.
# -----------------------------------------------------------------------------
def init_params(key, ntoken, ninp, nhid, nlayers):
    initrange = 0.1
    stdv = 1.0 / math.sqrt(nhid)
    keys = jax.random.split(key, 2 + 4 * nlayers)

    emb = jax.random.uniform(keys[0], (ntoken, ninp), jnp.float32, -initrange, initrange)
    dec_w = jax.random.uniform(keys[1], (ntoken, nhid), jnp.float32, -initrange, initrange)
    dec_b = jnp.zeros((1, ntoken), jnp.float32)

    wih_t, whh_t, b = [], [], []
    for l in range(nlayers):
        din = ninp if l == 0 else nhid
        k0, k1, k2, k3 = keys[2 + 4 * l: 6 + 4 * l]
        w_ih = jax.random.uniform(k0, (4 * nhid, din), jnp.float32, -stdv, stdv)
        w_hh = jax.random.uniform(k1, (4 * nhid, nhid), jnp.float32, -stdv, stdv)
        b_ih = jax.random.uniform(k2, (4 * nhid,), jnp.float32, -stdv, stdv)
        b_hh = jax.random.uniform(k3, (4 * nhid,), jnp.float32, -stdv, stdv)
        wih_t.append(w_ih.T.astype(jnp.bfloat16))       # (din, 4H)
        whh_t.append(w_hh.T.astype(jnp.bfloat16))       # (H, 4H)
        b.append((b_ih + b_hh).reshape(1, 4 * nhid))    # f32

    return {
        "emb": emb,                                     # (ntoken, ninp) f32
        "wih_t": wih_t,
        "whh_t": whh_t,
        "b": b,
        "dec_w_t": dec_w.T.astype(jnp.bfloat16),        # (H, ntoken)
        "dec_b": dec_b,                                 # (1, ntoken) f32
    }


if __name__ == "__main__":
    # Small, TPU-tile-friendly config; T=16 with time_chunk=8 exercises state carry across chunks.
    ntoken, ninp, nhid, nlayers = 256, 128, 128, 2
    T, B = 16, 8

    key = jax.random.PRNGKey(0)
    pkey, tkey = jax.random.split(key)
    params = init_params(pkey, ntoken, ninp, nhid, nlayers)

    tokens = jax.random.randint(tkey, (T, B), 0, ntoken, dtype=jnp.int32)
    h0 = jnp.zeros((nlayers, B, nhid), jnp.float32)
    c0 = jnp.zeros((nlayers, B, nhid), jnp.float32)

    fwd = jax.jit(rnnlm_forward)
    d, (hT, cT) = fwd(tokens, (h0, c0), params)
    jax.block_until_ready((d, hT, cT))

    assert d.shape == (T, B, ntoken)
    assert hT.shape == (nlayers, B, nhid) and cT.shape == (nlayers, B, nhid)
    assert bool(jnp.all(jnp.isfinite(d)))
    print("KERNEL_OK")
</pallas_src>

<mosaic_0001>
module attributes {stable_mosaic.version = 11 : i64} {
  func.func @lstm_layer_kernel(%arg0: i32, %arg1: memref<64x128xbf16, #tpu.memory_space<vmem>>, %arg2: memref<8x128xf32, #tpu.memory_space<vmem>>, %arg3: memref<8x128xf32, #tpu.memory_space<vmem>>, %arg4: memref<128x512xbf16, #tpu.memory_space<vmem>>, %arg5: memref<128x512xbf16, #tpu.memory_space<vmem>>, %arg6: memref<1x512xf32, #tpu.memory_space<vmem>>, %arg7: memref<8x8x128xbf16, #tpu.memory_space<vmem>>, %arg8: memref<8x128xf32, #tpu.memory_space<vmem>>, %arg9: memref<8x128xf32, #tpu.memory_space<vmem>>, %arg10: memref<8x128xf32, #tpu.memory_space<vmem>>, %arg11: memref<8x128xf32, #tpu.memory_space<vmem>>, %arg12: memref<64x512xf32, #tpu.memory_space<vmem>>) attributes {dimension_semantics = [#tpu.dimension_semantics<arbitrary>], iteration_bounds = array<i64: 2>, scalar_prefetch = 0 : i64, scratch_operands = 3 : i64, tpu.core_type = #tpu.core_type<tc>, window_params = [{transform_indices = @transform_0, window_bounds = array<i64: 64, 128>}, {pipeline_mode = #tpu.pipeline_mode<synchronous>, transform_indices = @transform_1, window_bounds = array<i64: 8, 128>}, {pipeline_mode = #tpu.pipeline_mode<synchronous>, transform_indices = @transform_2, window_bounds = array<i64: 8, 128>}, {pipeline_mode = #tpu.pipeline_mode<synchronous>, transform_indices = @transform_3, window_bounds = array<i64: 128, 512>}, {pipeline_mode = #tpu.pipeline_mode<synchronous>, transform_indices = @transform_4, window_bounds = array<i64: 128, 512>}, {pipeline_mode = #tpu.pipeline_mode<synchronous>, transform_indices = @transform_5, window_bounds = array<i64: 1, 512>}, {transform_indices = @transform_6, window_bounds = array<i64: 8, 8, 128>}, {pipeline_mode = #tpu.pipeline_mode<synchronous>, transform_indices = @transform_7, window_bounds = array<i64: 8, 128>}, {pipeline_mode = #tpu.pipeline_mode<synchronous>, transform_indices = @transform_8, window_bounds = array<i64: 8, 128>}]} {
    %c0_i32 = arith.constant 0 : i32
    %0 = arith.cmpi eq, %arg0, %c0_i32 : i32
    %1 = arith.extui %0 : i1 to i32
    %c0_i32_0 = arith.constant 0 : i32
    %2 = arith.cmpi ne, %1, %c0_i32_0 : i32
    scf.if %2 {
      %c0_12 = arith.constant 0 : index
      %c0_13 = arith.constant 0 : index
      %14 = vector.load %arg2[%c0_12, %c0_13] : memref<8x128xf32, #tpu.memory_space<vmem>>, vector<8x128xf32>
      %c0_14 = arith.constant 0 : index
      %c0_15 = arith.constant 0 : index
      %15 = vector.load %arg10[%c0_14, %c0_15] : memref<8x128xf32, #tpu.memory_space<vmem>>, vector<8x128xf32>
      tpu.vector_store %arg10[%c0_14, %c0_15], %14 {strides = array<i32>} : memref<8x128xf32, #tpu.memory_space<vmem>>, vector<8x128xf32>,
      %c0_16 = arith.constant 0 : index
      %c0_17 = arith.constant 0 : index
      %16 = vector.load %arg3[%c0_16, %c0_17] : memref<8x128xf32, #tpu.memory_space<vmem>>, vector<8x128xf32>
      %c0_18 = arith.constant 0 : index
      %c0_19 = arith.constant 0 : index
      %17 = vector.load %arg11[%c0_18, %c0_19] : memref<8x128xf32, #tpu.memory_space<vmem>>, vector<8x128xf32>
      tpu.vector_store %arg11[%c0_18, %c0_19], %16 {strides = array<i32>} : memref<8x128xf32, #tpu.memory_space<vmem>>, vector<8x128xf32>,
    } else {
    }
    %c0 = arith.constant 0 : index
    %c0_1 = arith.constant 0 : index
    %3 = vector.load %arg1[%c0, %c0_1] : memref<64x128xbf16, #tpu.memory_space<vmem>>, vector<64x128xbf16>
    %c0_2 = arith.constant 0 : index
    %c0_3 = arith.constant 0 : index
    %4 = vector.load %arg4[%c0_2, %c0_3] : memref<128x512xbf16, #tpu.memory_space<vmem>>, vector<128x512xbf16>
    %cst = arith.constant dense<0.000000e+00> : vector<64x512xf32>
    %5 = tpu.matmul %3, %4, %cst {dimension_numbers = #tpu.dot_dimension_numbers<[1], [0], [0], [1], [0, 0, 1, 1], [], []>} : vector<64x128xbf16>, vector<128x512xbf16>, vector<64x512xf32> -> vector<64x512xf32>
    %c0_4 = arith.constant 0 : index
    %c0_5 = arith.constant 0 : index
    %6 = vector.load %arg6[%c0_4, %c0_5] : memref<1x512xf32, #tpu.memory_space<vmem>>, vector<1x512xf32>
    %7 = vector.broadcast %6 : vector<1x512xf32> to vector<64x512xf32>
    %8 = arith.addf %5, %7 : vector<64x512xf32>
    %c0_6 = arith.constant 0 : index
    %c0_7 = arith.constant 0 : index
    %9 = vector.load %arg12[%c0_6, %c0_7] : memref<64x512xf32, #tpu.memory_space<vmem>>, vector<64x512xf32>
    tpu.vector_store %arg12[%c0_6, %c0_7], %8 {strides = array<i32>} : memref<64x512xf32, #tpu.memory_space<vmem>>, vector<64x512xf32>,
    %c0_i32_8 = arith.constant 0 : i32
    %c8_i32 = arith.constant 8 : i32
    %10 = arith.addi %c0_i32_8, %c8_i32 : i32
    %c1_i32 = arith.constant 1 : i32
    scf.for %arg13 = %c0_i32_8 to %10 step %c1_i32  : i32 {
      %c1_i32_12 = arith.constant 1 : i32
      %14 = arith.muli %arg13, %c1_i32_12 : i32
      %c0_i32_13 = arith.constant 0 : i32
      %15 = arith.addi %c0_i32_13, %14 : i32
      %c0_14 = arith.constant 0 : index
      %c0_15 = arith.constant 0 : index
      %16 = vector.load %arg10[%c0_14, %c0_15] : memref<8x128xf32, #tpu.memory_space<vmem>>, vector<8x128xf32>
      %c0_16 = arith.constant 0 : index
      %c0_17 = arith.constant 0 : index
      %17 = vector.load %arg11[%c0_16, %c0_17] : memref<8x128xf32, #tpu.memory_space<vmem>>, vector<8x128xf32>
      %c8_i32_18 = arith.constant 8 : i32
      %18 = arith.muli %15, %c8_i32_18 : i32
      %19 = tpu.assume_multiple %18, 8 : i32
      %20 = arith.index_cast %19 : i32 to index
      %c0_19 = arith.constant 0 : index
      %21 = vector.load %arg12[%20, %c0_19] : memref<64x512xf32, #tpu.memory_space<vmem>>, vector<8x512xf32>
      %22 = arith.truncf %16 : vector<8x128xf32> to vector<8x128xbf16>
      %c0_20 = arith.constant 0 : index
      %c0_21 = arith.constant 0 : index
      %23 = vector.load %arg5[%c0_20, %c0_21] : memref<128x512xbf16, #tpu.memory_space<vmem>>, vector<128x512xbf16>
      %cst_22 = arith.constant dense<0.000000e+00> : vector<8x512xf32>
      %24 = tpu.matmul %22, %23, %cst_22 {dimension_numbers = #tpu.dot_dimension_numbers<[1], [0], [0], [1], [0, 0, 1, 1], [], []>} : vector<8x128xbf16>, vector<128x512xbf16>, vector<8x512xf32> -> vector<8x512xf32>
      %25 = arith.addf %21, %24 : vector<8x512xf32>
      %26 = vector.extract_strided_slice %25 {offsets = [0, 0], sizes = [8, 128], strides = [1, 1]} : vector<8x512xf32> to vector<8x128xf32>
      %27 = arith.negf %26 : vector<8x128xf32>
      %28 = math.exp %27 : vector<8x128xf32>
      %cst_23 = arith.constant 1.000000e+00 : f32
      %29 = vector.broadcast %cst_23 : f32 to vector<8x128xf32>
      %30 = arith.addf %29, %28 : vector<8x128xf32>
      %31 = arith.divf %29, %30 : vector<8x128xf32>
      %32 = vector.extract_strided_slice %25 {offsets = [0, 128], sizes = [8, 128], strides = [1, 1]} : vector<8x512xf32> to vector<8x128xf32>
      %33 = arith.negf %32 : vector<8x128xf32>
      %34 = math.exp %33 : vector<8x128xf32>
      %cst_24 = arith.constant 1.000000e+00 : f32
      %35 = vector.broadcast %cst_24 : f32 to vector<8x128xf32>
      %36 = arith.addf %35, %34 : vector<8x128xf32>
      %37 = arith.divf %35, %36 : vector<8x128xf32>
      %38 = vector.extract_strided_slice %25 {offsets = [0, 256], sizes = [8, 128], strides = [1, 1]} : vector<8x512xf32> to vector<8x128xf32>
      %39 = math.tanh %38 : vector<8x128xf32>
      %40 = vector.extract_strided_slice %25 {offsets = [0, 384], sizes = [8, 128], strides = [1, 1]} : vector<8x512xf32> to vector<8x128xf32>
      %41 = arith.negf %40 : vector<8x128xf32>
      %42 = math.exp %41 : vector<8x128xf32>
      %cst_25 = arith.constant 1.000000e+00 : f32
      %43 = vector.broadcast %cst_25 : f32 to vector<8x128xf32>
      %44 = arith.addf %43, %42 : vector<8x128xf32>
      %45 = arith.divf %43, %44 : vector<8x128xf32>
      %46 = arith.mulf %37, %17 : vector<8x128xf32>
      %47 = arith.mulf %31, %39 : vector<8x128xf32>
      %48 = arith.addf %46, %47 : vector<8x128xf32>
      %49 = math.tanh %48 : vector<8x128xf32>
      %50 = arith.mulf %45, %49 : vector<8x128xf32>
      %c0_26 = arith.constant 0 : index
      %c0_27 = arith.constant 0 : index
      %51 = vector.load %arg10[%c0_26, %c0_27] : memref<8x128xf32, #tpu.memory_space<vmem>>, vector<8x128xf32>
      tpu.vector_store %arg10[%c0_26, %c0_27], %50 {strides = array<i32>} : memref<8x128xf32, #tpu.memory_space<vmem>>, vector<8x128xf32>,
      %c0_28 = arith.constant 0 : index
      %c0_29 = arith.constant 0 : index
      %52 = vector.load %arg11[%c0_28, %c0_29] : memref<8x128xf32, #tpu.memory_space<vmem>>, vector<8x128xf32>
      tpu.vector_store %arg11[%c0_28, %c0_29], %48 {strides = array<i32>} : memref<8x128xf32, #tpu.memory_space<vmem>>, vector<8x128xf32>,
      %53 = arith.truncf %50 : vector<8x128xf32> to vector<8x128xbf16>
      %54 = arith.index_cast %15 : i32 to index
      %c0_30 = arith.constant 0 : index
      %c0_31 = arith.constant 0 : index
      %55 = vector.load %arg7[%54, %c0_30, %c0_31] : memref<8x8x128xbf16, #tpu.memory_space<vmem>>, vector<1x8x128xbf16>
      %56 = vector.shape_cast %55 : vector<1x8x128xbf16> to vector<8x128xbf16>
      %57 = vector.shape_cast %53 : vector<8x128xbf16> to vector<1x8x128xbf16>
      tpu.vector_store %arg7[%54, %c0_30, %c0_31], %57 {strides = array<i32>} : memref<8x8x128xbf16, #tpu.memory_space<vmem>>, vector<1x8x128xbf16>,
    }
    %c8_i32_9 = arith.constant 8 : i32
    %c1_i32_10 = arith.constant 1 : i32
    %11 = arith.cmpi eq, %arg0, %c1_i32_10 : i32
    %12 = arith.extui %11 : i1 to i32
    %c0_i32_11 = arith.constant 0 : i32
    %13 = arith.cmpi ne, %12, %c0_i32_11 : i32
    scf.if %13 {
      %c0_12 = arith.constant 0 : index
      %c0_13 = arith.constant 0 : index
      %14 = vector.load %arg10[%c0_12, %c0_13] : memref<8x128xf32, #tpu.memory_space<vmem>>, vector<8x128xf32>
      %c0_14 = arith.constant 0 : index
      %c0_15 = arith.constant 0 : index
      %15 = vector.load %arg8[%c0_14, %c0_15] : memref<8x128xf32, #tpu.memory_space<vmem>>, vector<8x128xf32>
      tpu.vector_store %arg8[%c0_14, %c0_15], %14 {strides = array<i32>} : memref<8x128xf32, #tpu.memory_space<vmem>>, vector<8x128xf32>,
      %c0_16 = arith.constant 0 : index
      %c0_17 = arith.constant 0 : index
      %16 = vector.load %arg11[%c0_16, %c0_17] : memref<8x128xf32, #tpu.memory_space<vmem>>, vector<8x128xf32>
      %c0_18 = arith.constant 0 : index
      %c0_19 = arith.constant 0 : index
      %17 = vector.load %arg9[%c0_18, %c0_19] : memref<8x128xf32, #tpu.memory_space<vmem>>, vector<8x128xf32>
      tpu.vector_store %arg9[%c0_18, %c0_19], %16 {strides = array<i32>} : memref<8x128xf32, #tpu.memory_space<vmem>>, vector<8x128xf32>,
    } else {
    }
    return
  }
  func.func @transform_0(%arg0: i32) -> (i32, i32) {
    %c0_i32 = arith.constant 0 : i32
    %c0_i32_0 = arith.constant 0 : i32
    return %arg0, %c0_i32 : i32, i32
  }
  func.func @transform_1(%arg0: i32) -> (i32, i32) {
    %c0_i32 = arith.constant 0 : i32
    %c0_i32_0 = arith.constant 0 : i32
    %c0_i32_1 = arith.constant 0 : i32
    return %c0_i32, %c0_i32_0 : i32, i32
  }
  func.func @transform_2(%arg0: i32) -> (i32, i32) {
    %c0_i32 = arith.constant 0 : i32
    %c0_i32_0 = arith.constant 0 : i32
    %c0_i32_1 = arith.constant 0 : i32
    return %c0_i32, %c0_i32_0 : i32, i32
  }
  func.func @transform_3(%arg0: i32) -> (i32, i32) {
    %c0_i32 = arith.constant 0 : i32
    %c0_i32_0 = arith.constant 0 : i32
    %c0_i32_1 = arith.constant 0 : i32
    return %c0_i32, %c0_i32_0 : i32, i32
  }
  func.func @transform_4(%arg0: i32) -> (i32, i32) {
    %c0_i32 = arith.constant 0 : i32
    %c0_i32_0 = arith.constant 0 : i32
    %c0_i32_1 = arith.constant 0 : i32
    return %c0_i32, %c0_i32_0 : i32, i32
  }
  func.func @transform_5(%arg0: i32) -> (i32, i32) {
    %c0_i32 = arith.constant 0 : i32
    %c0_i32_0 = arith.constant 0 : i32
    %c0_i32_1 = arith.constant 0 : i32
    return %c0_i32, %c0_i32_0 : i32, i32
  }
  func.func @transform_6(%arg0: i32) -> (i32, i32, i32) {
    %c0_i32 = arith.constant 0 : i32
    %c0_i32_0 = arith.constant 0 : i32
    %c0_i32_1 = arith.constant 0 : i32
    return %arg0, %c0_i32, %c0_i32_0 : i32, i32, i32
  }
  func.func @transform_7(%arg0: i32) -> (i32, i32) {
    %c0_i32 = arith.constant 0 : i32
    %c0_i32_0 = arith.constant 0 : i32
    %c0_i32_1 = arith.constant 0 : i32
    return %c0_i32, %c0_i32_0 : i32, i32
  }
  func.func @transform_8(%arg0: i32) -> (i32, i32) {
    %c0_i32 = arith.constant 0 : i32
    %c0_i32_0 = arith.constant 0 : i32
    %c0_i32_1 = arith.constant 0 : i32
    return %c0_i32, %c0_i32_0 : i32, i32
  }
}

module attributes {stable_mosaic.version = 11 : i64} {
  func.func @lstm_layer_kernel(%arg0: i32, %arg1: memref<64x128xbf16, #tpu.memory_space<vmem>>, %arg2: memref<8x128xf32, #tpu.memory_space<vmem>>, %arg3: memref<8x128xf32, #tpu.memory_space<vmem>>, %arg4: memref<128x512xbf16, #tpu.memory_space<vmem>>, %arg5: memref<128x512xbf16, #tpu.memory_space<vmem>>, %arg6: memref<1x512xf32, #tpu.memory_space<vmem>>, %arg7: memref<8x8x128xbf16, #tpu.memory_space<vmem>>, %arg8: memref<8x128xf32, #tpu.memory_space<vmem>>, %arg9: memref<8x128xf32, #tpu.memory_space<vmem>>, %arg10: memref<8x128xf32, #tpu.memory_space<vmem>>, %arg11: memref<8x128xf32, #tpu.memory_space<vmem>>, %arg12: memref<64x512xf32, #tpu.memory_space<vmem>>) attributes {dimension_semantics = [#tpu.dimension_semantics<arbitrary>], iteration_bounds = array<i64: 2>, scalar_prefetch = 0 : i64, scratch_operands = 3 : i64, tpu.core_type = #tpu.core_type<tc>, window_params = [{transform_indices = @transform_0, window_bounds = array<i64: 64, 128>}, {pipeline_mode = #tpu.pipeline_mode<synchronous>, transform_indices = @transform_1, window_bounds = array<i64: 8, 128>}, {pipeline_mode = #tpu.pipeline_mode<synchronous>, transform_indices = @transform_2, window_bounds = array<i64: 8, 128>}, {pipeline_mode = #tpu.pipeline_mode<synchronous>, transform_indices = @transform_3, window_bounds = array<i64: 128, 512>}, {pipeline_mode = #tpu.pipeline_mode<synchronous>, transform_indices = @transform_4, window_bounds = array<i64: 128, 512>}, {pipeline_mode = #tpu.pipeline_mode<synchronous>, transform_indices = @transform_5, window_bounds = array<i64: 1, 512>}, {transform_indices = @transform_6, window_bounds = array<i64: 8, 8, 128>}, {pipeline_mode = #tpu.pipeline_mode<synchronous>, transform_indices = @transform_7, window_bounds = array<i64: 8, 128>}, {pipeline_mode = #tpu.pipeline_mode<synchronous>, transform_indices = @transform_8, window_bounds = array<i64: 8, 128>}]} {
    %c0_i32 = arith.constant 0 : i32
    %0 = arith.cmpi eq, %arg0, %c0_i32 : i32
    %1 = arith.extui %0 : i1 to i32
    %c0_i32_0 = arith.constant 0 : i32
    %2 = arith.cmpi ne, %1, %c0_i32_0 : i32
    scf.if %2 {
      %c0_12 = arith.constant 0 : index
      %c0_13 = arith.constant 0 : index
      %14 = vector.load %arg2[%c0_12, %c0_13] : memref<8x128xf32, #tpu.memory_space<vmem>>, vector<8x128xf32>
      %c0_14 = arith.constant 0 : index
      %c0_15 = arith.constant 0 : index
      %15 = vector.load %arg10[%c0_14, %c0_15] : memref<8x128xf32, #tpu.memory_space<vmem>>, vector<8x128xf32>
      tpu.vector_store %arg10[%c0_14, %c0_15], %14 {strides = array<i32>} : memref<8x128xf32, #tpu.memory_space<vmem>>, vector<8x128xf32>,
      %c0_16 = arith.constant 0 : index
      %c0_17 = arith.constant 0 : index
      %16 = vector.load %arg3[%c0_16, %c0_17] : memref<8x128xf32, #tpu.memory_space<vmem>>, vector<8x128xf32>
      %c0_18 = arith.constant 0 : index
      %c0_19 = arith.constant 0 : index
      %17 = vector.load %arg11[%c0_18, %c0_19] : memref<8x128xf32, #tpu.memory_space<vmem>>, vector<8x128xf32>
      tpu.vector_store %arg11[%c0_18, %c0_19], %16 {strides = array<i32>} : memref<8x128xf32, #tpu.memory_space<vmem>>, vector<8x128xf32>,
    } else {
    }
    %c0 = arith.constant 0 : index
    %c0_1 = arith.constant 0 : index
    %3 = vector.load %arg1[%c0, %c0_1] : memref<64x128xbf16, #tpu.memory_space<vmem>>, vector<64x128xbf16>
    %c0_2 = arith.constant 0 : index
    %c0_3 = arith.constant 0 : index
    %4 = vector.load %arg4[%c0_2, %c0_3] : memref<128x512xbf16, #tpu.memory_space<vmem>>, vector<128x512xbf16>
    %cst = arith.constant dense<0.000000e+00> : vector<64x512xf32>
    %5 = tpu.matmul %3, %4, %cst {dimension_numbers = #tpu.dot_dimension_numbers<[1], [0], [0], [1], [0, 0, 1, 1], [], []>} : vector<64x128xbf16>, vector<128x512xbf16>, vector<64x512xf32> -> vector<64x512xf32>
    %c0_4 = arith.constant 0 : index
    %c0_5 = arith.constant 0 : index
    %6 = vector.load %arg6[%c0_4, %c0_5] : memref<1x512xf32, #tpu.memory_space<vmem>>, vector<1x512xf32>
    %7 = vector.broadcast %6 : vector<1x512xf32> to vector<64x512xf32>
    %8 = arith.addf %5, %7 : vector<64x512xf32>
    %c0_6 = arith.constant 0 : index
    %c0_7 = arith.constant 0 : index
    %9 = vector.load %arg12[%c0_6, %c0_7] : memref<64x512xf32, #tpu.memory_space<vmem>>, vector<64x512xf32>
    tpu.vector_store %arg12[%c0_6, %c0_7], %8 {strides = array<i32>} : memref<64x512xf32, #tpu.memory_space<vmem>>, vector<64x512xf32>,
    %c0_i32_8 = arith.constant 0 : i32
    %c8_i32 = arith.constant 8 : i32
    %10 = arith.addi %c0_i32_8, %c8_i32 : i32
    %c1_i32 = arith.constant 1 : i32
    scf.for %arg13 = %c0_i32_8 to %10 step %c1_i32  : i32 {
      %c1_i32_12 = arith.constant 1 : i32
      %14 = arith.muli %arg13, %c1_i32_12 : i32
      %c0_i32_13 = arith.constant 0 : i32
      %15 = arith.addi %c0_i32_13, %14 : i32
      %c0_14 = arith.constant 0 : index
      %c0_15 = arith.constant 0 : index
      %16 = vector.load %arg10[%c0_14, %c0_15] : memref<8x128xf32, #tpu.memory_space<vmem>>, vector<8x128xf32>
      %c0_16 = arith.constant 0 : index
      %c0_17 = arith.constant 0 : index
      %17 = vector.load %arg11[%c0_16, %c0_17] : memref<8x128xf32, #tpu.memory_space<vmem>>, vector<8x128xf32>
      %c8_i32_18 = arith.constant 8 : i32
      %18 = arith.muli %15, %c8_i32_18 : i32
      %19 = tpu.assume_multiple %18, 8 : i32
      %20 = arith.index_cast %19 : i32 to index
      %c0_19 = arith.constant 0 : index
      %21 = vector.load %arg12[%20, %c0_19] : memref<64x512xf32, #tpu.memory_space<vmem>>, vector<8x512xf32>
      %22 = arith.truncf %16 : vector<8x128xf32> to vector<8x128xbf16>
      %c0_20 = arith.constant 0 : index
      %c0_21 = arith.constant 0 : index
      %23 = vector.load %arg5[%c0_20, %c0_21] : memref<128x512xbf16, #tpu.memory_space<vmem>>, vector<128x512xbf16>
      %cst_22 = arith.constant dense<0.000000e+00> : vector<8x512xf32>
      %24 = tpu.matmul %22, %23, %cst_22 {dimension_numbers = #tpu.dot_dimension_numbers<[1], [0], [0], [1], [0, 0, 1, 1], [], []>} : vector<8x128xbf16>, vector<128x512xbf16>, vector<8x512xf32> -> vector<8x512xf32>
      %25 = arith.addf %21, %24 : vector<8x512xf32>
      %26 = vector.extract_strided_slice %25 {offsets = [0, 0], sizes = [8, 128], strides = [1, 1]} : vector<8x512xf32> to vector<8x128xf32>
      %27 = arith.negf %26 : vector<8x128xf32>
      %28 = math.exp %27 : vector<8x128xf32>
      %cst_23 = arith.constant 1.000000e+00 : f32
      %29 = vector.broadcast %cst_23 : f32 to vector<8x128xf32>
      %30 = arith.addf %29, %28 : vector<8x128xf32>
      %31 = arith.divf %29, %30 : vector<8x128xf32>
      %32 = vector.extract_strided_slice %25 {offsets = [0, 128], sizes = [8, 128], strides = [1, 1]} : vector<8x512xf32> to vector<8x128xf32>
      %33 = arith.negf %32 : vector<8x128xf32>
      %34 = math.exp %33 : vector<8x128xf32>
      %cst_24 = arith.constant 1.000000e+00 : f32
      %35 = vector.broadcast %cst_24 : f32 to vector<8x128xf32>
      %36 = arith.addf %35, %34 : vector<8x128xf32>
      %37 = arith.divf %35, %36 : vector<8x128xf32>
      %38 = vector.extract_strided_slice %25 {offsets = [0, 256], sizes = [8, 128], strides = [1, 1]} : vector<8x512xf32> to vector<8x128xf32>
      %39 = math.tanh %38 : vector<8x128xf32>
      %40 = vector.extract_strided_slice %25 {offsets = [0, 384], sizes = [8, 128], strides = [1, 1]} : vector<8x512xf32> to vector<8x128xf32>
      %41 = arith.negf %40 : vector<8x128xf32>
      %42 = math.exp %41 : vector<8x128xf32>
      %cst_25 = arith.constant 1.000000e+00 : f32
      %43 = vector.broadcast %cst_25 : f32 to vector<8x128xf32>
      %44 = arith.addf %43, %42 : vector<8x128xf32>
      %45 = arith.divf %43, %44 : vector<8x128xf32>
      %46 = arith.mulf %37, %17 : vector<8x128xf32>
      %47 = arith.mulf %31, %39 : vector<8x128xf32>
      %48 = arith.addf %46, %47 : vector<8x128xf32>
      %49 = math.tanh %48 : vector<8x128xf32>
      %50 = arith.mulf %45, %49 : vector<8x128xf32>
      %c0_26 = arith.constant 0 : index
      %c0_27 = arith.constant 0 : index
      %51 = vector.load %arg10[%c0_26, %c0_27] : memref<8x128xf32, #tpu.memory_space<vmem>>, vector<8x128xf32>
      tpu.vector_store %arg10[%c0_26, %c0_27], %50 {strides = array<i32>} : memref<8x128xf32, #tpu.memory_space<vmem>>, vector<8x128xf32>,
      %c0_28 = arith.constant 0 : index
      %c0_29 = arith.constant 0 : index
      %52 = vector.load %arg11[%c0_28, %c0_29] : memref<8x128xf32, #tpu.memory_space<vmem>>, vector<8x128xf32>
      tpu.vector_store %arg11[%c0_28, %c0_29], %48 {strides = array<i32>} : memref<8x128xf32, #tpu.memory_space<vmem>>, vector<8x128xf32>,
      %53 = arith.truncf %50 : vector<8x128xf32> to vector<8x128xbf16>
      %54 = arith.index_cast %15 : i32 to index
      %c0_30 = arith.constant 0 : index
      %c0_31 = arith.constant 0 : index
      %55 = vector.load %arg7[%54, %c0_30, %c0_31] : memref<8x8x128xbf16, #tpu.memory_space<vmem>>, vector<1x8x128xbf16>
      %56 = vector.shape_cast %55 : vector<1x8x128xbf16> to vector<8x128xbf16>
      %57 = vector.shape_cast %53 : vector<8x128xbf16> to vector<1x8x128xbf16>
      tpu.vector_store %arg7[%54, %c0_30, %c0_31], %57 {strides = array<i32>} : memref<8x8x128xbf16, #tpu.memory_space<vmem>>, vector<1x8x128xbf16>,
    }
    %c8_i32_9 = arith.constant 8 : i32
    %c1_i32_10 = arith.constant 1 : i32
    %11 = arith.cmpi eq, %arg0, %c1_i32_10 : i32
    %12 = arith.extui %11 : i1 to i32
    %c0_i32_11 = arith.constant 0 : i32
    %13 = arith.cmpi ne, %12, %c0_i32_11 : i32
    scf.if %13 {
      %c0_12 = arith.constant 0 : index
      %c0_13 = arith.constant 0 : index
      %14 = vector.load %arg10[%c0_12, %c0_13] : memref<8x128xf32, #tpu.memory_space<vmem>>, vector<8x128xf32>
      %c0_14 = arith.constant 0 : index
      %c0_15 = arith.constant 0 : index
      %15 = vector.load %arg8[%c0_14, %c0_15] : memref<8x128xf32, #tpu.memory_space<vmem>>, vector<8x128xf32>
      tpu.vector_store %arg8[%c0_14, %c0_15], %14 {strides = array<i32>} : memref<8x128xf32, #tpu.memory_space<vmem>>, vector<8x128xf32>,
      %c0_16 = arith.constant 0 : index
      %c0_17 = arith.constant 0 : index
      %16 = vector.load %arg11[%c0_16, %c0_17] : memref<8x128xf32, #tpu.memory_space<vmem>>, vector<8x128xf32>
      %c0_18 = arith.constant 0 : index
      %c0_19 = arith.constant 0 : index
      %17 = vector.load %arg9[%c0_18, %c0_19] : memref<8x128xf32, #tpu.memory_space<vmem>>, vector<8x128xf32>
      tpu.vector_store %arg9[%c0_18, %c0_19], %16 {strides = array<i32>} : memref<8x128xf32, #tpu.memory_space<vmem>>, vector<8x128xf32>,
    } else {
    }
    return
  }
  func.func @transform_0(%arg0: i32) -> (i32, i32) {
    %c0_i32 = arith.constant 0 : i32
    %c0_i32_0 = arith.constant 0 : i32
    return %arg0, %c0_i32 : i32, i32
  }
  func.func @transform_1(%arg0: i32) -> (i32, i32) {
    %c0_i32 = arith.constant 0 : i32
    %c0_i32_0 = arith.constant 0 : i32
    %c0_i32_1 = arith.constant 0 : i32
    return %c0_i32, %c0_i32_0 : i32, i32
  }
  func.func @transform_2(%arg0: i32) -> (i32, i32) {
    %c0_i32 = arith.constant 0 : i32
    %c0_i32_0 = arith.constant 0 : i32
    %c0_i32_1 = arith.constant 0 : i32
    return %c0_i32, %c0_i32_0 : i32, i32
  }
  func.func @transform_3(%arg0: i32) -> (i32, i32) {
    %c0_i32 = arith.constant 0 : i32
    %c0_i32_0 = arith.constant 0 : i32
    %c0_i32_1 = arith.constant 0 : i32
    return %c0_i32, %c0_i32_0 : i32, i32
  }
  func.func @transform_4(%arg0: i32) -> (i32, i32) {
    %c0_i32 = arith.constant 0 : i32
    %c0_i32_0 = arith.constant 0 : i32
    %c0_i32_1 = arith.constant 0 : i32
    return %c0_i32, %c0_i32_0 : i32, i32
  }
  func.func @transform_5(%arg0: i32) -> (i32, i32) {
    %c0_i32 = arith.constant 0 : i32
    %c0_i32_0 = arith.constant 0 : i32
    %c0_i32_1 = arith.constant 0 : i32
    return %c0_i32, %c0_i32_0 : i32, i32
  }
  func.func @transform_6(%arg0: i32) -> (i32, i32, i32) {
    %c0_i32 = arith.constant 0 : i32
    %c0_i32_0 = arith.constant 0 : i32
    %c0_i32_1 = arith.constant 0 : i32
    return %arg0, %c0_i32, %c0_i32_0 : i32, i32, i32
  }
  func.func @transform_7(%arg0: i32) -> (i32, i32) {
    %c0_i32 = arith.constant 0 : i32
    %c0_i32_0 = arith.constant 0 : i32
    %c0_i32_1 = arith.constant 0 : i32
    return %c0_i32, %c0_i32_0 : i32, i32
  }
  func.func @transform_8(%arg0: i32) -> (i32, i32) {
    %c0_i32 = arith.constant 0 : i32
    %c0_i32_0 = arith.constant 0 : i32
    %c0_i32_1 = arith.constant 0 : i32
    return %c0_i32, %c0_i32_0 : i32, i32
  }
}

module attributes {stable_mosaic.version = 11 : i64} {
  func.func @decoder_kernel(%arg0: i32, %arg1: i32, %arg2: memref<128x128xbf16, #tpu.memory_space<vmem>>, %arg3: memref<128x256xbf16, #tpu.memory_space<vmem>>, %arg4: memref<1x256xf32, #tpu.memory_space<vmem>>, %arg5: memref<128x256xf32, #tpu.memory_space<vmem>>) attributes {dimension_semantics = [#tpu.dimension_semantics<parallel>, #tpu.dimension_semantics<parallel>], iteration_bounds = array<i64: 1, 1>, scalar_prefetch = 0 : i64, scratch_operands = 0 : i64, tpu.core_type = #tpu.core_type<tc>, window_params = [{transform_indices = @transform_0, window_bounds = array<i64: 128, 128>}, {transform_indices = @transform_1, window_bounds = array<i64: 128, 256>}, {transform_indices = @transform_2, window_bounds = array<i64: 1, 256>}, {transform_indices = @transform_3, window_bounds = array<i64: 128, 256>}]} {
    %c0 = arith.constant 0 : index
    %c0_0 = arith.constant 0 : index
    %0 = vector.load %arg2[%c0, %c0_0] : memref<128x128xbf16, #tpu.memory_space<vmem>>, vector<128x128xbf16>
    %c0_1 = arith.constant 0 : index
    %c0_2 = arith.constant 0 : index
    %1 = vector.load %arg3[%c0_1, %c0_2] : memref<128x256xbf16, #tpu.memory_space<vmem>>, vector<128x256xbf16>
    %cst = arith.constant dense<0.000000e+00> : vector<128x256xf32>
    %2 = tpu.matmul %0, %1, %cst {dimension_numbers = #tpu.dot_dimension_numbers<[1], [0], [0], [1], [0, 0, 1, 1], [], []>} : vector<128x128xbf16>, vector<128x256xbf16>, vector<128x256xf32> -> vector<128x256xf32>
    %c0_3 = arith.constant 0 : index
    %c0_4 = arith.constant 0 : index
    %3 = vector.load %arg4[%c0_3, %c0_4] : memref<1x256xf32, #tpu.memory_space<vmem>>, vector<1x256xf32>
    %4 = vector.broadcast %3 : vector<1x256xf32> to vector<128x256xf32>
    %5 = arith.addf %2, %4 : vector<128x256xf32>
    %c0_5 = arith.constant 0 : index
    %c0_6 = arith.constant 0 : index
    %6 = vector.load %arg5[%c0_5, %c0_6] : memref<128x256xf32, #tpu.memory_space<vmem>>, vector<128x256xf32>
    tpu.vector_store %arg5[%c0_5, %c0_6], %5 {strides = array<i32>} : memref<128x256xf32, #tpu.memory_space<vmem>>, vector<128x256xf32>,
    return
  }
  func.func @transform_0(%arg0: i32, %arg1: i32) -> (i32, i32) {
    %c0_i32 = arith.constant 0 : i32
    %c0_i32_0 = arith.constant 0 : i32
    return %arg0, %c0_i32 : i32, i32
  }
  func.func @transform_1(%arg0: i32, %arg1: i32) -> (i32, i32) {
    %c0_i32 = arith.constant 0 : i32
    %c0_i32_0 = arith.constant 0 : i32
    return %c0_i32, %arg1 : i32, i32
  }
  func.func @transform_2(%arg0: i32, %arg1: i32) -> (i32, i32) {
    %c0_i32 = arith.constant 0 : i32
    %c0_i32_0 = arith.constant 0 : i32
    return %c0_i32, %arg1 : i32, i32
  }
  func.func @transform_3(%arg0: i32, %arg1: i32) -> (i32, i32) {
    %c0_i32 = arith.constant 0 : i32
    return %arg0, %arg1 : i32, i32
  }
}

</mosaic_0001>

<bundles_post_ra>
// kernel: rnnlm_forward.4
= control target key start
LH: loop header
LB: loop body
LE: loop exit
PB: predicated region body
PF: predicated region fallthrough
CT: control target
= control target key end

     0   :  { %14 = vsyncpa [#allocation6], 0  ;;  %s1847_s0 = inlined_call_operand.vmem [shape: bf16[128,128], index: 0, kind: input, shape index: {}]   ;;  %s1848_s1 = inlined_call_operand.vmem [shape: f32[8,128], index: 1, kind: input, shape index: {}]   ;;  %s1849_s2 = inlined_call_operand.vmem [shape: f32[8,128], index: 2, kind: input, shape index: {}]   ;;  %s1850_s3 = inlined_call_operand.hbm [shape: bf16[128,512], index: 3, kind: input, shape index: {}]   ;;  %s1851_s4 = inlined_call_operand.hbm [shape: bf16[128,512], index: 4, kind: input, shape index: {}]   ;;  %s1852_s5 = inlined_call_operand.vmem [shape: f32[1,512], index: 5, kind: input, shape index: {}]   ;;  %s1853_s6 = inlined_call_operand.vmem [shape: bf16[16,8,128], index: 6, kind: output, shape index: {0}]   ;;  %s1854_s7 = inlined_call_operand.vmem [shape: f32[8,128], index: 7, kind: output, shape index: {1}]   ;;  %s1855_s8 = inlined_call_operand.vmem [shape: f32[8,128], index: 8, kind: output, shape index: {2}]  }
   0x1   :  { %15 = vsyncpa [#allocation8], 0  ;;  %s1724_s27 = smov 0  }
   0x2 LB: > { %s242_s30 = sshll.u32 %s1850_s3, 4  ;;  %s1733_s9 = sadd.s32 4294967295, %s1669_s27   ;;  %s1669_s27 = sphi %s1724_s27, %s21_s27   ;;  %s243_s30 = int_to_ptr.hbm [resolvable:$true] %s242_s30 }
   0x3   : > { %p1173_p0 = scmp.ge.s32.totalorder %s1669_s27, 1  ;;  %p225_p1 = scmp.lt.s32.totalorder %s1669_s27, 3 }
   0x4   : > { %p1174_p2 = scmp.ne.s32.totalorder %s1733_s9, 0  ;;  %p1551_p3 = scmp.eq.s32.totalorder %s1733_s9, 0 }
   0x5   : > { %p1739_p4 = pnand %p1173_p0, %p225_p1  ;;  %s1675_s11 = smov [#allocation5]  }
   0x6   : > { %s244_s12 = sshll.u32 %s1675_s11, 4  ;;  %s256_s15 = sshll.u32 %s1851_s4, 4  ;;  %s245_s12 = int_to_ptr.vmem [resolvable:$true] %s244_s12  ;;  %s257_s15 = int_to_ptr.hbm [resolvable:$true] %s256_s15 }
   0x7   : > { %p1544_p5 = pneg %p1739_p4  ;;  %s1676_s16 = smov [#allocation7]  }
   0x8   : > { %s258_s17 = sshll.u32 %s1676_s16, 4  ;;  %s1677_s18 = smov 256   ;;  %s259_s17 = int_to_ptr.vmem [resolvable:$true] %s258_s17 }
   0x9   : > { %p1545_p6 = pnand %p1551_p3, %p1544_p5  ;;  %s1678_s19 = smov 16  }
   0xa   : > { %286 = sbr.rel (%p1739_p4) target bundleno = 469 (0x1d5), region = 44 }
   0xb   : > { %1547 = dma.hbm_to_vmem [thread:$0]  (!%p1545_p6), %s243_s30, 4096, %s245_s12, [#allocation6], %s1677_s18, %s1677_s18, %s1678_s19  }
   0xc   : > { %1550 = dma.hbm_to_vmem [thread:$0]  (!%p1545_p6), %s257_s15, 4096, %s259_s17, [#allocation8], %s1677_s18, %s1677_s18, %s1678_s19  }
   0xf   : > { %1660 = dma.done.wait (%p1551_p3), [#allocation6], 4096  }
  0x10   : > { %1662 = vsyncadd (%p1551_p3), [#allocation6], 4294963200 }
  0x11   : > { %1664 = dma.done.wait (%p1551_p3), [#allocation8], 4096  }
  0x12   : > { %1666 = vsyncadd (%p1551_p3), [#allocation8], 4294963200  ;;  %s1180_s20 = sshll.u32 %s1733_s9, 3 }
  0x13   : > { %p327_p7 = scmp.lt.s32.totalorder %s1180_s20, 15  ;;  %341 = sbr.rel (%p1174_p2) target bundleno = 27 (0x1b), region = 56 }
  0x15   : > { %s1858_s20 = smov (!%p327_p7, %s1180_s20), 15 }
  0x16   : > { %s1181_s21 = sshll.u32 %s1858_s20, 2 }
  0x17   : > { %s1764_s24 = scalar_lea.vmem %s1847_s0, %s1181_s21  ;;  %s1769_s28 = scalar_lea.vmem %s1853_s6, %s1181_s21 }
  0x18   : > { %v342_v0 = vld [vmem:[%s1848_s1] sm:$0xff] }
  0x19   : > { %v344_v1 = vld [vmem:[%s1849_s2] sm:$0xff]  ;;  %343 = vst [vmem:[#allocation2] sm:$0xff] %v342_v0 }
  0x1a   : > { %345 = vst [vmem:[#allocation3] sm:$0xff] %v344_v1 }
  0x1b PF: > { %v1315_v2 = vld [vmem:[#allocation5 + $0xe0] sm:$0xf]  ;;  %v1501_v3 = vld [vmem:[#allocation5 + $0xec] sm:$0xf0]  ;;  %v1499_v4 = vld [vmem:[#allocation5 + $0xe4] sm:$0xf] }
  0x1c   : > { %v1316_v5 = vor.u32 %v1501_v3, %v1315_v2  ;;  %v1317_v6 = vld [vmem:[#allocation5 + $0xf0] sm:$0xf0]  ;;  %v1323_v7 = vld [vmem:[#allocation5 + $0xe8] sm:$0xf]  ;;  %v1502_v8 = vld [vmem:[#allocation5 + $0xf4] sm:$0xf0] }
  0x1d   : > { %v1320_v9 = vor.u32 %v1499_v4, %v1317_v6  ;;  %v1324_v10 = vor.u32 %v1502_v8, %v1323_v7  ;;  %v1500_v11 = vld [vmem:[#allocation5 + $0xec] sm:$0xf]  ;;  %v1325_v12 = vld [vmem:[#allocation5 + $0xf8] sm:$0xf0]  ;;  %v1299_v13 = vld [vmem:[#allocation5 + $0xc0] sm:$0xf] }
  0x1e   : > { %580 = vmatpush.bf16.msra.mxu0 %v1316_v5  ;;  %v1328_v14 = vor.u32 %v1500_v11, %v1325_v12  ;;  %v1497_v15 = vld [vmem:[#allocation5 + $0xcc] sm:$0xf0]  ;;  %v1495_v16 = vld [vmem:[#allocation5 + $0xc4] sm:$0xf]  ;;  %v1301_v17 = vld [vmem:[#allocation5 + $0xd0] sm:$0xf0] }
  0x1f   : > { %609 = vmatpush.bf16.msra.mxu1 %v1320_v9  ;;  %638 = vmatpush.bf16.msra.mxu2 %v1324_v10  ;;  %v1300_v18 = vor.u32 %v1497_v15, %v1299_v13  ;;  %v1304_v19 = vor.u32 %v1495_v16, %v1301_v17  ;;  %v1307_v20 = vld [vmem:[#allocation5 + $0xc8] sm:$0xf]  ;;  %v1498_v21 = vld [vmem:[#allocation5 + $0xd4] sm:$0xf0]  ;;  %v1496_v22 = vld [vmem:[#allocation5 + $0xcc] sm:$0xf] }
  0x20   : > { %667 = vmatpush.bf16.msra.mxu3 %v1328_v14  ;;  %v1308_v23 = vor.u32 %v1498_v21, %v1307_v20  ;;  %v1309_v24 = vld [vmem:[#allocation5 + $0xd8] sm:$0xf0]  ;;  %v1283_v25 = vld [vmem:[#allocation5 + $0xa0] sm:$0xf]  ;;  %v1493_v26 = vld [vmem:[#allocation5 + $0xac] sm:$0xf0] }
  0x21   : > { %v1312_v27 = vor.u32 %v1496_v22, %v1309_v24  ;;  %v1491_v28 = vld [vmem:[#allocation5 + $0xa4] sm:$0xf]  ;;  %v1285_v29 = vld [vmem:[#allocation5 + $0xb0] sm:$0xf0]  ;;  %v1291_v30 = vld [vmem:[#allocation5 + $0xa8] sm:$0xf]  ;;  %v1284_v31 = vor.u32 %v1493_v26, %v1283_v25 }
  0x22   : > { %581 = vmatpush.bf16.msra.mxu0 %v1300_v18  ;;  %v1494_v32 = vld [vmem:[#allocation5 + $0xb4] sm:$0xf0]  ;;  %v1492_v33 = vld [vmem:[#allocation5 + $0xac] sm:$0xf]  ;;  %v1293_v34 = vld [vmem:[#allocation5 + $0xb8] sm:$0xf0]  ;;  %v1288_v35 = vor.u32 %v1491_v28, %v1285_v29 }
  0x23   : > { %610 = vmatpush.bf16.msra.mxu1 %v1304_v19  ;;  %639 = vmatpush.bf16.msra.mxu2 %v1308_v23  ;;  %v1292_v36 = vor.u32 %v1494_v32, %v1291_v30  ;;  %v1267_v37 = vld [vmem:[#allocation5 + $0x80] sm:$0xf]  ;;  %v1489_v38 = vld [vmem:[#allocation5 + $0x8c] sm:$0xf0]  ;;  %v1487_v39 = vld [vmem:[#allocation5 + $0x84] sm:$0xf]  ;;  %v1296_v40 = vor.u32 %v1492_v33, %v1293_v34 }
  0x24   : > { %668 = vmatpush.bf16.msra.mxu3 %v1312_v27  ;;  %v1269_v41 = vld [vmem:[#allocation5 + $0x90] sm:$0xf0]  ;;  %v1275_v42 = vld [vmem:[#allocation5 + $0x88] sm:$0xf]  ;;  %v1490_v43 = vld [vmem:[#allocation5 + $0x94] sm:$0xf0]  ;;  %v1268_v46 = vor.u32 %v1489_v38, %v1267_v37 }
  0x25   : > { %v1488_v44 = vld [vmem:[#allocation5 + $0x8c] sm:$0xf]  ;;  %v1277_v45 = vld [vmem:[#allocation5 + $0x98] sm:$0xf0]  ;;  %v1272_v47 = vor.u32 %v1487_v39, %v1269_v41  ;;  %v1276_v48 = vor.u32 %v1490_v43, %v1275_v42  ;;  %v1251_v49 = vld [vmem:[#allocation5 + $0x60] sm:$0xf] }
  0x26   : > { %582 = vmatpush.bf16.msra.mxu0 %v1284_v31  ;;  %v1485_v50 = vld [vmem:[#allocation5 + $0x6c] sm:$0xf0]  ;;  %v1483_v51 = vld [vmem:[#allocation5 + $0x64] sm:$0xf]  ;;  %v1280_v52 = vor.u32 %v1488_v44, %v1277_v45  ;;  %v1253_v53 = vld [vmem:[#allocation5 + $0x70] sm:$0xf0] }
  0x27   : > { %611 = vmatpush.bf16.msra.mxu1 %v1288_v35  ;;  %640 = vmatpush.bf16.msra.mxu2 %v1292_v36  ;;  %v1259_v54 = vld [vmem:[#allocation5 + $0x68] sm:$0xf]  ;;  %v1486_v55 = vld [vmem:[#allocation5 + $0x74] sm:$0xf0]  ;;  %v1484_v56 = vld [vmem:[#allocation5 + $0x6c] sm:$0xf]  ;;  %v1252_v58 = vor.u32 %v1485_v50, %v1251_v49  ;;  %v1256_v59 = vor.u32 %v1483_v51, %v1253_v53 }
  0x28   : > { %669 = vmatpush.bf16.msra.mxu3 %v1296_v40  ;;  %v1261_v57 = vld [vmem:[#allocation5 + $0x78] sm:$0xf0]  ;;  %v1260_v60 = vor.u32 %v1486_v55, %v1259_v54  ;;  %v1235_v61 = vld [vmem:[#allocation5 + $0x40] sm:$0xf]  ;;  %v1481_v62 = vld [vmem:[#allocation5 + $0x4c] sm:$0xf0] }
  0x29   : > { %v1479_v63 = vld [vmem:[#allocation5 + $0x44] sm:$0xf]  ;;  %v1264_v0 = vor.u32 %v1484_v56, %v1261_v57  ;;  %v1237_v1 = vld [vmem:[#allocation5 + $0x50] sm:$0xf0]  ;;  %v1243_v2 = vld [vmem:[#allocation5 + $0x48] sm:$0xf]  ;;  %v1236_v6 = vor.u32 %v1481_v62, %v1235_v61 }
  0x2a   : > { %583 = vmatpush.bf16.msra.mxu0 %v1268_v46  ;;  %v1482_v3 = vld [vmem:[#allocation5 + $0x54] sm:$0xf0]  ;;  %v1480_v4 = vld [vmem:[#allocation5 + $0x4c] sm:$0xf]  ;;  %v1245_v5 = vld [vmem:[#allocation5 + $0x58] sm:$0xf0]  ;;  %v1240_v7 = vor.u32 %v1479_v63, %v1237_v1 }
  0x2b   : > { %612 = vmatpush.bf16.msra.mxu1 %v1272_v47  ;;  %641 = vmatpush.bf16.msra.mxu2 %v1276_v48  ;;  %v1244_v8 = vor.u32 %v1482_v3, %v1243_v2  ;;  %v1219_v9 = vld [vmem:[#allocation5 + $0x20] sm:$0xf]  ;;  %v1477_v10 = vld [vmem:[#allocation5 + $0x2c] sm:$0xf0]  ;;  %v1475_v11 = vld [vmem:[#allocation5 + $0x24] sm:$0xf]  ;;  %v1248_v12 = vor.u32 %v1480_v4, %v1245_v5 }
  0x2c   : > { %670 = vmatpush.bf16.msra.mxu3 %v1280_v52  ;;  %v1221_v13 = vld [vmem:[#allocation5 + $0x30] sm:$0xf0]  ;;  %v1227_v14 = vld [vmem:[#allocation5 + $0x28] sm:$0xf]  ;;  %v1478_v15 = vld [vmem:[#allocation5 + $0x34] sm:$0xf0]  ;;  %v1220_v18 = vor.u32 %v1477_v10, %v1219_v9 }
  0x2d   : > { %v1476_v16 = vld [vmem:[#allocation5 + $0x2c] sm:$0xf]  ;;  %v1229_v17 = vld [vmem:[#allocation5 + $0x38] sm:$0xf0]  ;;  %v1224_v19 = vor.u32 %v1475_v11, %v1221_v13  ;;  %v1228_v20 = vor.u32 %v1478_v15, %v1227_v14  ;;  %v1203_v21 = vld [vmem:[#allocation5] sm:$0xf] }
  0x2e   : > { %584 = vmatpush.bf16.msra.mxu0 %v1252_v58  ;;  %v1473_v22 = vld [vmem:[#allocation5 + $0xc] sm:$0xf0]  ;;  %v1471_v23 = vld [vmem:[#allocation5 + $0x4] sm:$0xf]  ;;  %v1232_v24 = vor.u32 %v1476_v16, %v1229_v17  ;;  %v1205_v25 = vld [vmem:[#allocation5 + $0x10] sm:$0xf0] }
  0x2f   : > { %613 = vmatpush.bf16.msra.mxu1 %v1256_v59  ;;  %642 = vmatpush.bf16.msra.mxu2 %v1260_v60  ;;  %v1211_v26 = vld [vmem:[#allocation5 + $0x8] sm:$0xf]  ;;  %v1474_v27 = vld [vmem:[#allocation5 + $0x14] sm:$0xf0]  ;;  %v1472_v28 = vld [vmem:[#allocation5 + $0xc] sm:$0xf]  ;;  %v1204_v30 = vor.u32 %v1473_v22, %v1203_v21  ;;  %v1208_v31 = vor.u32 %v1471_v23, %v1205_v25 }
  0x30   : > { %671 = vmatpush.bf16.msra.mxu3 %v1264_v0  ;;  %v1213_v29 = vld [vmem:[#allocation5 + $0x18] sm:$0xf0]  ;;  %v1212_v32 = vor.u32 %v1474_v27, %v1211_v26  ;;  %v1467_v34 = vld [vmem:[%s1764_s24] sm:$0xff]  ;;  %v1469_v36 = vld [vmem:[%s1764_s24 + $0x10] sm:$0xff]  ;;  %s1826_s14 = smov 0  }
  0x31   : > { %v1216_v33 = vor.u32 %v1472_v28, %v1213_v29  ;;  %v1468_v35 = vld [vmem:[%s1764_s24 + $0x8] sm:$0xff]  ;;  %v1470_v37 = vld [vmem:[%s1764_s24 + $0x18] sm:$0xff]  ;;  %v386_v38 = vld [vmem:[%s1852_s5] sm:$0xf] }
  0x32   : > { %585 = vmatpush.bf16.msra.mxu0 %v1236_v6  ;;  %v1786_v39 = vperm.slane %v386_v38, 0  ;;  %v1788_v40 = vperm.slane %v386_v38, 1  ;;  %v1792_v45 = vperm.slane %v386_v38, 2  ;;  %v1794_v46 = vperm.slane %v386_v38, 3 }
  0x33   : > { %614 = vmatpush.bf16.msra.mxu1 %v1240_v7  ;;  %643 = vmatpush.bf16.msra.mxu2 %v1244_v8 }
  0x34   : > { %672 = vmatpush.bf16.msra.mxu3 %v1248_v12 }
  0x36   : > { %586 = vmatpush.bf16.msra.mxu0 %v1220_v18 }
  0x37   : > { %615 = vmatpush.bf16.msra.mxu1 %v1224_v19  ;;  %644 = vmatpush.bf16.msra.mxu2 %v1228_v20 }
  0x38   : > { %673 = vmatpush.bf16.msra.mxu3 %v1232_v24 }
  0x3a   : > { %587 = vmatpush.bf16.msra.mxu0 %v1204_v30 }
  0x3b   : > { %616 = vmatpush.bf16.msra.mxu1 %v1208_v31  ;;  %645 = vmatpush.bf16.msra.mxu2 %v1212_v32 }
  0x3c   : > { %674 = vmatpush.bf16.msra.mxu3 %v1216_v33 }
  0x3d   : > { %588 = vmatmul.bf16.vlgmr.msra.gmra.mxu0 %v1467_v34 }
  0x3e   : > { %617 = vmatmul.bf16.vlgmr.msra.gmra.mxu1 %v1467_v34  ;;  %646 = vmatmul.bf16.vlgmr.msra.gmra.mxu2 %v1467_v34 }
  0x3f   : > { %675 = vmatmul.bf16.vlgmr.msra.gmra.mxu3 %v1467_v34 }
  0x4d   : > { %593 = vmatmul.bf16.gmra.mxu0 %v1468_v35 }
  0x4e   : > { %622 = vmatmul.bf16.gmra.mxu1 %v1468_v35  ;;  %651 = vmatmul.bf16.gmra.mxu2 %v1468_v35 }
  0x4f   : > { %680 = vmatmul.bf16.gmra.mxu3 %v1468_v35 }
  0x5d   : > { %598 = vmatmul.bf16.gmra.mxu0 %v1469_v36 }
  0x5e   : > { %627 = vmatmul.bf16.gmra.mxu1 %v1469_v36  ;;  %656 = vmatmul.bf16.gmra.mxu2 %v1469_v36 }
  0x5f   : > { %685 = vmatmul.bf16.gmra.mxu3 %v1469_v36 }
  0x6d   : > { %603 = vmatmul.bf16.gmra.mxu0 %v1470_v37 }
  0x6e   : > { %632 = vmatmul.bf16.gmra.mxu1 %v1470_v37  ;;  %661 = vmatmul.bf16.gmra.mxu2 %v1470_v37 }
  0x6f   : > { %690 = vmatmul.bf16.gmra.mxu3 %v1470_v37 }
  0xba   : > { %v589_v41 = vpop.f32.mrf.mxu0 }
  0xbb   : > { %v590_v42 = vadd.f32 %v589_v41, %v1786_v39  ;;  %v618_v43 = vpop.f32.mrf.mxu1 }
  0xbc   : > { %v619_v44 = vadd.f32 %v618_v43, %v1788_v40 }
  0xbd   : > { %696 = vst [vmem:[#allocation4] sm:$0xff] %v590_v42 }
  0xbe   : > { %697 = vst [vmem:[#allocation4 + $0x8] sm:$0xff] %v619_v44 }
  0xc1   : > { %v647_v47 = vpop.f32.mrf.mxu2 }
  0xc2   : > { %v648_v48 = vadd.f32 %v647_v47, %v1792_v45  ;;  %v676_v49 = vpop.f32.mrf.mxu3  ;;  %v591_v50 = vpop.f32.mrf.mxu0 }
  0xc3   : > { %v677_v51 = vadd.f32 %v676_v49, %v1794_v46  ;;  %v592_v52 = vadd.f32 %v591_v50, %v1786_v39  ;;  %v620_v53 = vpop.f32.mrf.mxu1 }
  0xc4   : > { %698 = vst [vmem:[#allocation4 + $0x10] sm:$0xff] %v648_v48  ;;  %v621_v54 = vadd.f32 %v620_v53, %v1788_v40 }
  0xc5   : > { %699 = vst [vmem:[#allocation4 + $0x18] sm:$0xff] %v677_v51 }
  0xc6   : > { %700 = vst [vmem:[#allocation4 + $0x20] sm:$0xff] %v592_v52 }
  0xc7   : > { %701 = vst [vmem:[#allocation4 + $0x28] sm:$0xff] %v621_v54 }
  0xc9   : > { %v649_v55 = vpop.f32.mrf.mxu2 }
  0xca   : > { %v650_v56 = vadd.f32 %v649_v55, %v1792_v45  ;;  %v678_v57 = vpop.f32.mrf.mxu3  ;;  %v594_v58 = vpop.f32.mrf.mxu0 }
  0xcb   : > { %v679_v59 = vadd.f32 %v678_v57, %v1794_v46  ;;  %v595_v60 = vadd.f32 %v594_v58, %v1786_v39  ;;  %v623_v61 = vpop.f32.mrf.mxu1 }
  0xcc   : > { %702 = vst [vmem:[#allocation4 + $0x30] sm:$0xff] %v650_v56  ;;  %v624_v62 = vadd.f32 %v623_v61, %v1788_v40 }
  0xcd   : > { %703 = vst [vmem:[#allocation4 + $0x38] sm:$0xff] %v679_v59 }
  0xce   : > { %704 = vst [vmem:[#allocation4 + $0x40] sm:$0xff] %v595_v60 }
  0xcf   : > { %705 = vst [vmem:[#allocation4 + $0x48] sm:$0xff] %v624_v62 }
  0xd1   : > { %v652_v63 = vpop.f32.mrf.mxu2 }
  0xd2   : > { %v653_v0 = vadd.f32 %v652_v63, %v1792_v45  ;;  %v681_v1 = vpop.f32.mrf.mxu3  ;;  %v596_v2 = vpop.f32.mrf.mxu0 }
  0xd3   : > { %v682_v3 = vadd.f32 %v681_v1, %v1794_v46  ;;  %v597_v4 = vadd.f32 %v596_v2, %v1786_v39  ;;  %v625_v5 = vpop.f32.mrf.mxu1 }
  0xd4   : > { %706 = vst [vmem:[#allocation4 + $0x50] sm:$0xff] %v653_v0  ;;  %v626_v6 = vadd.f32 %v625_v5, %v1788_v40 }
  0xd5   : > { %707 = vst [vmem:[#allocation4 + $0x58] sm:$0xff] %v682_v3 }
  0xd6   : > { %708 = vst [vmem:[#allocation4 + $0x60] sm:$0xff] %v597_v4 }
  0xd7   : > { %709 = vst [vmem:[#allocation4 + $0x68] sm:$0xff] %v626_v6 }
  0xd9   : > { %v654_v7 = vpop.f32.mrf.mxu2 }
  0xda   : > { %v655_v8 = vadd.f32 %v654_v7, %v1792_v45  ;;  %v683_v9 = vpop.f32.mrf.mxu3  ;;  %v599_v10 = vpop.f32.mrf.mxu0 }
  0xdb   : > { %v684_v11 = vadd.f32 %v683_v9, %v1794_v46  ;;  %v600_v12 = vadd.f32 %v599_v10, %v1786_v39  ;;  %v628_v13 = vpop.f32.mrf.mxu1 }
  0xdc   : > { %710 = vst [vmem:[#allocation4 + $0x70] sm:$0xff] %v655_v8  ;;  %v629_v14 = vadd.f32 %v628_v13, %v1788_v40 }
  0xdd   : > { %711 = vst [vmem:[#allocation4 + $0x78] sm:$0xff] %v684_v11 }
  0xde   : > { %712 = vst [vmem:[#allocation4 + $0x80] sm:$0xff] %v600_v12 }
  0xdf   : > { %713 = vst [vmem:[#allocation4 + $0x88] sm:$0xff] %v629_v14 }
  0xe1   : > { %v657_v15 = vpop.f32.mrf.mxu2 }
  0xe2   : > { %v658_v16 = vadd.f32 %v657_v15, %v1792_v45  ;;  %v686_v17 = vpop.f32.mrf.mxu3  ;;  %v601_v18 = vpop.f32.mrf.mxu0 }
  0xe3   : > { %v687_v19 = vadd.f32 %v686_v17, %v1794_v46  ;;  %v602_v20 = vadd.f32 %v601_v18, %v1786_v39  ;;  %v630_v21 = vpop.f32.mrf.mxu1 }
  0xe4   : > { %714 = vst [vmem:[#allocation4 + $0x90] sm:$0xff] %v658_v16  ;;  %v631_v22 = vadd.f32 %v630_v21, %v1788_v40 }
  0xe5   : > { %715 = vst [vmem:[#allocation4 + $0x98] sm:$0xff] %v687_v19 }
  0xe6   : > { %716 = vst [vmem:[#allocation4 + $0xa0] sm:$0xff] %v602_v20 }
  0xe7   : > { %717 = vst [vmem:[#allocation4 + $0xa8] sm:$0xff] %v631_v22 }
  0xe9   : > { %v659_v23 = vpop.f32.mrf.mxu2 }
  0xea   : > { %v660_v24 = vadd.f32 %v659_v23, %v1792_v45  ;;  %v688_v25 = vpop.f32.mrf.mxu3  ;;  %v604_v26 = vpop.f32.mrf.mxu0 }
  0xeb   : > { %v689_v27 = vadd.f32 %v688_v25, %v1794_v46  ;;  %v605_v28 = vadd.f32 %v604_v26, %v1786_v39  ;;  %v633_v29 = vpop.f32.mrf.mxu1 }
  0xec   : > { %718 = vst [vmem:[#allocation4 + $0xb0] sm:$0xff] %v660_v24  ;;  %v634_v30 = vadd.f32 %v633_v29, %v1788_v40 }
  0xed   : > { %719 = vst [vmem:[#allocation4 + $0xb8] sm:$0xff] %v689_v27 }
  0xee   : > { %720 = vst [vmem:[#allocation4 + $0xc0] sm:$0xff] %v605_v28 }
  0xef   : > { %721 = vst [vmem:[#allocation4 + $0xc8] sm:$0xff] %v634_v30 }
  0xf1   : > { %v662_v31 = vpop.f32.mrf.mxu2 }
  0xf2   : > { %v663_v32 = vadd.f32 %v662_v31, %v1792_v45  ;;  %v691_v33 = vpop.f32.mrf.mxu3  ;;  %v606_v34 = vpop.f32.mrf.mxu0 }
  0xf3   : > { %v692_v35 = vadd.f32 %v691_v33, %v1794_v46  ;;  %v607_v36 = vadd.f32 %v606_v34, %v1786_v39  ;;  %v635_v37 = vpop.f32.mrf.mxu1 }
  0xf4   : > { %722 = vst [vmem:[#allocation4 + $0xd0] sm:$0xff] %v663_v32  ;;  %v636_v38 = vadd.f32 %v635_v37, %v1788_v40 }
  0xf5   : > { %723 = vst [vmem:[#allocation4 + $0xd8] sm:$0xff] %v692_v35 }
  0xf6   : > { %724 = vst [vmem:[#allocation4 + $0xe0] sm:$0xff] %v607_v36 }
  0xf7   : > { %725 = vst [vmem:[#allocation4 + $0xe8] sm:$0xff] %v636_v38 }
  0xf9   : > { %v664_v41 = vpop.f32.mrf.mxu2 }
  0xfa   : > { %v665_v42 = vadd.f32 %v664_v41, %v1792_v45  ;;  %v693_v43 = vpop.f32.mrf.mxu3 }
  0xfb   : > { %v694_v44 = vadd.f32 %v693_v43, %v1794_v46 }
  0xfc   : > { %726 = vst [vmem:[#allocation4 + $0xf0] sm:$0xff] %v665_v42 }
  0xfd   : > { %727 = vst [vmem:[#allocation4 + $0xf8] sm:$0xff] %v694_v44 }
  0xfe LB: >> { %v1446_v39 = vld [vmem:[#allocation7 + $0xe0] sm:$0xf]  ;;  %v1534_v40 = vld [vmem:[#allocation7 + $0xec] sm:$0xf0]  ;;  %v1532_v47 = vld [vmem:[#allocation7 + $0xe4] sm:$0xf]  ;;  %s1673_s14 = sphi %s1826_s14, %s733_s14  }
  0xff   : >> { %v1447_v48 = vor.u32 %v1534_v40, %v1446_v39  ;;  %v1448_v49 = vld [vmem:[#allocation7 + $0xf0] sm:$0xf0]  ;;  %v1533_v50 = vld [vmem:[#allocation7 + $0xec] sm:$0xf]  ;;  %v1456_v51 = vld [vmem:[#allocation7 + $0xf8] sm:$0xf0] }
 0x100   : >> { %v1451_v45 = vor.u32 %v1532_v47, %v1448_v49  ;;  %v1459_v52 = vor.u32 %v1533_v50, %v1456_v51  ;;  %v1430_v53 = vld [vmem:[#allocation7 + $0xc0] sm:$0xf]  ;;  %v1530_v46 = vld [vmem:[#allocation7 + $0xcc] sm:$0xf0]  ;;  %v1528_v54 = vld [vmem:[#allocation7 + $0xc4] sm:$0xf] }
 0x101   : >> { %939 = vmatpush.bf16.msra.mxu0 %v1447_v48  ;;  %v1431_v55 = vor.u32 %v1530_v46, %v1430_v53  ;;  %v1432_v56 = vld [vmem:[#allocation7 + $0xd0] sm:$0xf0]  ;;  %v1529_v57 = vld [vmem:[#allocation7 + $0xcc] sm:$0xf]  ;;  %v1440_v58 = vld [vmem:[#allocation7 + $0xd8] sm:$0xf0] }
 0x102   : >> { %952 = vmatpush.bf16.msra.mxu1 %v1451_v45  ;;  %978 = vmatpush.bf16.msra.mxu3 %v1459_v52  ;;  %v1435_v59 = vor.u32 %v1528_v54, %v1432_v56  ;;  %v1443_v60 = vor.u32 %v1529_v57, %v1440_v58  ;;  %v1454_v61 = vld [vmem:[#allocation7 + $0xe8] sm:$0xf]  ;;  %v1535_v62 = vld [vmem:[#allocation7 + $0xf4] sm:$0xf0]  ;;  %v1414_v63 = vld [vmem:[#allocation7 + $0xa0] sm:$0xf] }
 0x103   : >> { %v1455_v0 = vor.u32 %v1535_v62, %v1454_v61  ;;  %v1526_v1 = vld [vmem:[#allocation7 + $0xac] sm:$0xf0]  ;;  %v1524_v2 = vld [vmem:[#allocation7 + $0xa4] sm:$0xf]  ;;  %v1416_v3 = vld [vmem:[#allocation7 + $0xb0] sm:$0xf0] }
 0x104   : >> { %v1525_v4 = vld [vmem:[#allocation7 + $0xac] sm:$0xf]  ;;  %v1424_v5 = vld [vmem:[#allocation7 + $0xb8] sm:$0xf0]  ;;  %v1438_v6 = vld [vmem:[#allocation7 + $0xc8] sm:$0xf]  ;;  %v1415_v7 = vor.u32 %v1526_v1, %v1414_v63  ;;  %v1419_v11 = vor.u32 %v1524_v2, %v1416_v3 }
 0x105   : >> { %940 = vmatpush.bf16.msra.mxu0 %v1431_v55  ;;  %965 = vmatpush.bf16.msra.mxu2 %v1455_v0  ;;  %v1531_v8 = vld [vmem:[#allocation7 + $0xd4] sm:$0xf0]  ;;  %v1398_v9 = vld [vmem:[#allocation7 + $0x80] sm:$0xf]  ;;  %v1522_v10 = vld [vmem:[#allocation7 + $0x8c] sm:$0xf0]  ;;  %v1427_v12 = vor.u32 %v1525_v4, %v1424_v5 }
 0x106   : >> { %953 = vmatpush.bf16.msra.mxu1 %v1435_v59  ;;  %979 = vmatpush.bf16.msra.mxu3 %v1443_v60  ;;  %v1439_v13 = vor.u32 %v1531_v8, %v1438_v6  ;;  %v1520_v14 = vld [vmem:[#allocation7 + $0x84] sm:$0xf]  ;;  %v1400_v15 = vld [vmem:[#allocation7 + $0x90] sm:$0xf0]  ;;  %v1521_v16 = vld [vmem:[#allocation7 + $0x8c] sm:$0xf]  ;;  %v1399_v20 = vor.u32 %v1522_v10, %v1398_v9 }
 0x107   : >> { %v1408_v17 = vld [vmem:[#allocation7 + $0x98] sm:$0xf0]  ;;  %v1422_v18 = vld [vmem:[#allocation7 + $0xa8] sm:$0xf]  ;;  %v1527_v19 = vld [vmem:[#allocation7 + $0xb4] sm:$0xf0]  ;;  %v1403_v24 = vor.u32 %v1520_v14, %v1400_v15 }
 0x108   : >> { %v1423_v21 = vor.u32 %v1527_v19, %v1422_v18  ;;  %v1382_v22 = vld [vmem:[#allocation7 + $0x60] sm:$0xf]  ;;  %v1518_v23 = vld [vmem:[#allocation7 + $0x6c] sm:$0xf0]  ;;  %v1411_v25 = vor.u32 %v1521_v16, %v1408_v17  ;;  %v1516_v26 = vld [vmem:[#allocation7 + $0x64] sm:$0xf] }
 0x109   : >> { %941 = vmatpush.bf16.msra.mxu0 %v1415_v7  ;;  %966 = vmatpush.bf16.msra.mxu2 %v1439_v13  ;;  %v1406_v27 = vld [vmem:[#allocation7 + $0x88] sm:$0xf]  ;;  %v1523_v28 = vld [vmem:[#allocation7 + $0x94] sm:$0xf0]  ;;  %v1384_v29 = vld [vmem:[#allocation7 + $0x70] sm:$0xf0]  ;;  %v1383_v32 = vor.u32 %v1518_v23, %v1382_v22 }
 0x10a   : >> { %954 = vmatpush.bf16.msra.mxu1 %v1419_v11  ;;  %980 = vmatpush.bf16.msra.mxu3 %v1427_v12  ;;  %v1517_v30 = vld [vmem:[#allocation7 + $0x6c] sm:$0xf]  ;;  %v1392_v31 = vld [vmem:[#allocation7 + $0x78] sm:$0xf0]  ;;  %v1407_v33 = vor.u32 %v1523_v28, %v1406_v27  ;;  %v1366_v34 = vld [vmem:[#allocation7 + $0x40] sm:$0xf]  ;;  %v1387_v36 = vor.u32 %v1516_v26, %v1384_v29 }
 0x10b   : >> { %v1514_v35 = vld [vmem:[#allocation7 + $0x4c] sm:$0xf0]  ;;  %v1395_v37 = vor.u32 %v1517_v30, %v1392_v31  ;;  %v1512_v38 = vld [vmem:[#allocation7 + $0x44] sm:$0xf]  ;;  %v1390_v41 = vld [vmem:[#allocation7 + $0x68] sm:$0xf] }
 0x10c   : >> { %v1519_v42 = vld [vmem:[#allocation7 + $0x74] sm:$0xf0]  ;;  %v1368_v43 = vld [vmem:[#allocation7 + $0x50] sm:$0xf0]  ;;  %v1513_v44 = vld [vmem:[#allocation7 + $0x4c] sm:$0xf]  ;;  %v1367_v40 = vor.u32 %v1514_v35, %v1366_v34 }
 0x10d   : >> { %942 = vmatpush.bf16.msra.mxu0 %v1399_v20  ;;  %967 = vmatpush.bf16.msra.mxu2 %v1423_v21  ;;  %v1376_v39 = vld [vmem:[#allocation7 + $0x58] sm:$0xf0]  ;;  %v1391_v47 = vor.u32 %v1519_v42, %v1390_v41  ;;  %v1350_v48 = vld [vmem:[#allocation7 + $0x20] sm:$0xf]  ;;  %v1510_v49 = vld [vmem:[#allocation7 + $0x2c] sm:$0xf0]  ;;  %v1371_v50 = vor.u32 %v1512_v38, %v1368_v43 }
 0x10e   : >> { %955 = vmatpush.bf16.msra.mxu1 %v1403_v24  ;;  %981 = vmatpush.bf16.msra.mxu3 %v1411_v25  ;;  %v1379_v51 = vor.u32 %v1513_v44, %v1376_v39  ;;  %v1508_v45 = vld [vmem:[#allocation7 + $0x24] sm:$0xf]  ;;  %v1374_v52 = vld [vmem:[#allocation7 + $0x48] sm:$0xf]  ;;  %v1515_v53 = vld [vmem:[#allocation7 + $0x54] sm:$0xf0]  ;;  %v1351_v56 = vor.u32 %v1510_v49, %v1350_v48 }
 0x10f   : >> { %v1352_v46 = vld [vmem:[#allocation7 + $0x30] sm:$0xf0]  ;;  %v1509_v54 = vld [vmem:[#allocation7 + $0x2c] sm:$0xf]  ;;  %v1360_v55 = vld [vmem:[#allocation7 + $0x38] sm:$0xf0]  ;;  %v1375_v57 = vor.u32 %v1515_v53, %v1374_v52 }
 0x110   : >> { %v1334_v58 = vld [vmem:[#allocation7] sm:$0xf]  ;;  %v1506_v59 = vld [vmem:[#allocation7 + $0xc] sm:$0xf0]  ;;  %v1355_v60 = vor.u32 %v1508_v45, %v1352_v46  ;;  %v1363_v61 = vor.u32 %v1509_v54, %v1360_v55  ;;  %v1504_v62 = vld [vmem:[#allocation7 + $0x4] sm:$0xf] }
 0x111   : >> { %943 = vmatpush.bf16.msra.mxu0 %v1383_v32  ;;  %968 = vmatpush.bf16.msra.mxu2 %v1407_v33  ;;  %v1358_v63 = vld [vmem:[#allocation7 + $0x28] sm:$0xf]  ;;  %v1511_v0 = vld [vmem:[#allocation7 + $0x34] sm:$0xf0]  ;;  %v1336_v1 = vld [vmem:[#allocation7 + $0x10] sm:$0xf0]  ;;  %v1335_v4 = vor.u32 %v1506_v59, %v1334_v58 }
 0x112   : >> { %956 = vmatpush.bf16.msra.mxu1 %v1387_v36  ;;  %982 = vmatpush.bf16.msra.mxu3 %v1395_v37  ;;  %v1505_v2 = vld [vmem:[#allocation7 + $0xc] sm:$0xf]  ;;  %v1344_v3 = vld [vmem:[#allocation7 + $0x18] sm:$0xf0]  ;;  %v734_v5 = vld [vmem:[#allocation2] sm:$0xff]  ;;  %v1359_v6 = vor.u32 %v1511_v0, %v1358_v63  ;;  %v1339_v7 = vor.u32 %v1504_v62, %v1336_v1  ;;  %s1329_s15 = sshll.u32 %s1673_s14, 3 }
 0x113   : >> { %v1347_v8 = vor.u32 %v1505_v2, %v1344_v3  ;;  %v1342_v9 = vld [vmem:[#allocation7 + $0x8] sm:$0xf]  ;;  %v1507_v10 = vld [vmem:[#allocation7 + $0x14] sm:$0xf0]  ;;  %v746_v11 = vpack.c.bf16 %v734_v5, %v734_v5  ;;  %s737_s16 = sshra.s32 %s1329_s15, 3  ;;  %s1463_s19 = sshll.u32 %s1673_s14, 2 }
 0x114   : >> { %v1343_v12 = vor.u32 %v1507_v10, %v1342_v9  ;;  %s1503_s17 = sshll.u32 %s737_s16, 5  ;;  %s1062_s20 = scalar_lea.vmem %s1769_s28, %s1463_s19 }
 0x115   : >> { %944 = vmatpush.bf16.msra.mxu0 %v1367_v40  ;;  %969 = vmatpush.bf16.msra.mxu2 %v1391_v47  ;;  %s741_s18 = scalar_lea.vmem [#allocation4], %s1503_s17  ;;  %s733_s14 = sadd.s32 1, %s1673_s14  }
 0x116   : >> { %957 = vmatpush.bf16.msra.mxu1 %v1371_v50  ;;  %983 = vmatpush.bf16.msra.mxu3 %v1379_v51  ;;  %v742_v13 = vld [vmem:[%s741_s18] sm:$0xff]  ;;  %v743_v14 = vld [vmem:[%s741_s18 + $0x8] sm:$0xff]  ;;  %v745_v21 = vld [vmem:[%s741_s18 + $0x18] sm:$0xff]  ;;  %p730_p8 = scmp.ge.s32.totalorder %s733_s14, 8  }
 0x117   : >> { %v744_v32 = vld [vmem:[%s741_s18 + $0x10] sm:$0xff]  ;;  %p1464_p9 = scmp.ne.s32.totalorder (%p730_p8), %s1733_s9, 1 }
 0x119   : >> { %945 = vmatpush.bf16.msra.mxu0 %v1351_v56  ;;  %970 = vmatpush.bf16.msra.mxu2 %v1375_v57  ;;  %v735_v57 = vld [vmem:[#allocation3] sm:$0xff] }
 0x11a   : >> { %958 = vmatpush.bf16.msra.mxu1 %v1355_v60  ;;  %984 = vmatpush.bf16.msra.mxu3 %v1363_v61 }
 0x11d   : >> { %946 = vmatpush.bf16.msra.mxu0 %v1335_v4  ;;  %971 = vmatpush.bf16.msra.mxu2 %v1359_v6 }
 0x11e   : >> { %959 = vmatpush.bf16.msra.mxu1 %v1339_v7  ;;  %985 = vmatpush.bf16.msra.mxu3 %v1347_v8 }
 0x120   : >> { %947 = vmatmul.bf16.vlgmr.msra.gmra.mxu0 %v746_v11 }
 0x121   : >> { %960 = vmatmul.bf16.vlgmr.msra.gmra.mxu1 %v746_v11  ;;  %986 = vmatmul.bf16.vlgmr.msra.gmra.mxu3 %v746_v11 }
 0x122   : >> { %972 = vmatpush.bf16.msra.mxu2 %v1343_v12 }
 0x125   : >> { %973 = vmatmul.bf16.vlgmr.msra.gmra.mxu2 %v746_v11 }
 0x19d   : >> { %v948_v15 = vpop.f32.mrf.mxu0 }
 0x19e   : >> { %v991_v16 = vadd.f32 %v948_v15, %v742_v13  ;;  %v961_v17 = vpop.f32.mrf.mxu1 }
 0x19f   : >> { %v992_v18 = vadd.f32 %v961_v17, %v743_v14 }
 0x1a0   : >> { %v1460_v19 = vmul.f32 -1.442695, %v991_v16 }
 0x1a1   : >> { %v1461_v20 = vmul.f32 -1.442695, %v992_v18 }
 0x1a2   : >> { %1575 = vpow2.f32 %v1460_v19 }
 0x1a3   : >> { %1577 = vpow2.f32 %v1461_v20 }
 0x1a4   : >> { %v987_v22 = vpop.f32.mrf.mxu3 }
 0x1a5   : >> { %v994_v23 = vadd.f32 %v987_v22, %v745_v21  ;;  %v950_v24 = vpop.f32.mrf.mxu0 }
 0x1a6   : >> { %v963_v25 = vpop.f32.mrf.mxu1 }
 0x1a7   : >> { %v1462_v26 = vmul.f32 -1.442695, %v994_v23 }
 0x1a8   : >> { %v1576_v27 = vpop.eup %1575  ;;  %v974_v28 = vpop.f32.mrf.mxu2 }
 0x1a9   : >> { %v1578_v29 = vpop.eup %1577  ;;  %v998_v30 = vadd.f32 1.0, %v1576_v27  ;;  %1579 = vpow2.f32 %v1462_v26  ;;  %v993_v35 = vadd.f32 %v974_v28, %v744_v32 }
 0x1aa   : >> { %v1017_v31 = vadd.f32 1.0, %v1578_v29 }
 0x1ab   : >> { %1581 = vrcp.f32 %v998_v30  ;;  %v1010_v40 = vand.u32 2147483648, %v998_v30  ;;  %v1008_v49 = vand.u32 2147483647, %v998_v30  ;;  %vm1004_vm2 = vweird.f32 %v998_v30 }
 0x1ac   : >> { %1583 = vrcp.f32 %v1017_v31  ;;  %v989_v33 = vpop.f32.mrf.mxu3  ;;  %v1029_v47 = vand.u32 2147483648, %v1017_v31  ;;  %v1027_v51 = vand.u32 2147483647, %v1017_v31  ;;  %vm1023_vm3 = vweird.f32 %v1017_v31 }
 0x1ad   : >> { %v1011_v54 = vor.u32 1.1754944e-38, %v1010_v40  ;;  %vm1009_vm6 = vcmp.eq.f32.partialorder %v1008_v49, 8.507059e+37 }
 0x1ae   : >> { %v1030_v56 = vor.u32 1.1754944e-38, %v1029_v47  ;;  %vm1028_vm7 = vcmp.eq.f32.partialorder %v1027_v51, 8.507059e+37 }
 0x1af   : >> { %v1580_v34 = vpop.eup %1579 }
 0x1b0   : >> { %v1037_v36 = vadd.f32 1.0, %v1580_v34  ;;  %v976_v37 = vpop.f32.mrf.mxu2 }
 0x1b1   : >> { %v1582_v38 = vpop.eup %1581 }
 0x1b2   : >> { %v1584_v41 = vpop.eup %1583  ;;  %v1000_v42 = vmul.f32 %v1582_v38, %v998_v30  ;;  %1585 = vrcp.f32 %v1037_v36  ;;  %vm1005_vm0 = vweird.f32 %v1582_v38  ;;  %v1049_v4 = vand.u32 2147483648, %v1037_v36 }
 0x1b3   : >> { %v1019_v43 = vmul.f32 %v1584_v41, %v1017_v31  ;;  %1587 = vtanh.f32 %v993_v35  ;;  %vm1024_vm1 = vweird.f32 %v1584_v41  ;;  %vm1006_vm4 = vmor %vm1004_vm2, %vm1005_vm0  ;;  %vm1043_vm9 = vweird.f32 %v1037_v36 }
 0x1b4   : >> { %v1001_v44 = vsub.f32 1.0, %v1000_v42  ;;  %vm1025_vm5 = vmor %vm1023_vm3, %vm1024_vm1  ;;  %v1047_v5 = vand.u32 2147483647, %v1037_v36  ;;  %v1050_v7 = vor.u32 1.1754944e-38, %v1049_v4 }
 0x1b5   : >> { %v1020_v39 = vsub.f32 1.0, %v1019_v43 }
 0x1b6   : >> { %v1002_v48 = vmul.f32 %v1582_v38, %v1001_v44  ;;  %vm1048_vm11 = vcmp.eq.f32.partialorder %v1047_v5, 8.507059e+37 }
 0x1b7   : >> { %v1021_v50 = vmul.f32 %v1584_v41, %v1020_v39 }
 0x1b8   : >> { %v1586_v45 = vpop.eup %1585  ;;  %v1003_v52 = vadd.f32 %v1582_v38, %v1002_v48 }
 0x1b9   : >> { %v1588_v53 = vpop.eup %1587  ;;  %v1039_v46 = vmul.f32 %v1586_v45, %v1037_v36  ;;  %v1022_v55 = vadd.f32 %v1584_v41, %v1021_v50  ;;  %vm1044_vm8 = vweird.f32 %v1586_v45 }
 0x1ba   : >> { %v1007_v58 = vsel %vm1006_vm4, %v1582_v38, %v1003_v52  ;;  %vm1045_vm10 = vmor %vm1043_vm9, %vm1044_vm8 }
 0x1bb   : >> { %v1040_v59 = vsub.f32 1.0, %v1039_v46  ;;  %v1012_v60 = vsel %vm1009_vm6, %v1011_v54, %v1007_v58  ;;  %v1026_v61 = vsel %vm1025_vm5, %v1584_v41, %v1022_v55 }
 0x1bc   : >> { %v1031_v62 = vsel %vm1028_vm7, %v1030_v56, %v1026_v61  ;;  %v1054_v63 = vmul.f32 %v1588_v53, %v1012_v60 }
 0x1bd   : >> { %v1041_v0 = vmul.f32 %v1586_v45, %v1040_v59  ;;  %v1053_v1 = vmul.f32 %v1031_v62, %v735_v57 }
 0x1bf   : >> { %v1055_v2 = vadd.f32 %v1054_v63, %v1053_v1  ;;  %v1042_v3 = vadd.f32 %v1586_v45, %v1041_v0 }
 0x1c1   : >> { %1589 = vtanh.f32 %v1055_v2  ;;  %1059 = vst [vmem:[#allocation3] sm:$0xff] %v1055_v2  ;;  %v1046_v6 = vsel %vm1045_vm10, %v1586_v45, %v1042_v3 }
 0x1c2   : >> { %v1051_v9 = vsel %vm1048_vm11, %v1050_v7, %v1046_v6 }
 0x1c7   : >> { %v1590_v8 = vpop.eup %1589 }
 0x1c8   : >> { %v1057_v10 = vmul.f32 %v1590_v8, %v1051_v9  ;;  %732 = sbr.rel (!%p730_p8) target bundleno = 254 (0xfe), region = 116 }
 0x1ca   : >> { %1058 = vst [vmem:[#allocation2] sm:$0xff] %v1057_v10  ;;  %v1060_v11 = vpack.c.bf16 %v1057_v10, %v1057_v10 }
 0x1cc   : >> { %1063 = vst [vmem:[%s1062_s20] sm:$0xf] %v1060_v11 }
 0x1cd   : > { %1067 = sbr.rel (%p1464_p9) target bundleno = 469 (0x1d5), region = 67 }
 0x1d2   : > { %v1068_v12 = vld [vmem:[#allocation2] sm:$0xff]  ;;  %v1070_v13 = vld [vmem:[#allocation3] sm:$0xff] }
 0x1d3   : > { %1069 = vst [vmem:[%s1854_s7] sm:$0xff] %v1068_v12 }
 0x1d4   : > { %1071 = vst [vmem:[%s1855_s8] sm:$0xff] %v1070_v13 }
 0x1d5 PF: > { %s21_s27 = sadd.s32 1, %s1669_s27  }
 0x1d6   : > { %p18_p10 = scmp.ge.s32.totalorder %s21_s27, 4  }
 0x1d8   :  { %20 = sbr.rel (!%p18_p10) target bundleno = 2 (0x2), region = 127 }
 0x1dd   :  { %1106 = vsyncpa [#allocation6], 1 }
 0x1de   :  { %1108 = vsyncpa [#allocation6 + $0x1], 1 }
 0x1df   :  { %1109 = vsyncpa [#allocation8], 1 }

// kernel: rnnlm_forward.3
= control target key start
LH: loop header
LB: loop body
LE: loop exit
PB: predicated region body
PF: predicated region fallthrough
CT: control target
= control target key end

     0   :  { %s1569_s27 = smov 0   ;;  %s2049_s0 = inlined_call_operand.vmem [shape: bf16[128,128], index: 0, kind: input, shape index: {}]   ;;  %s2050_s1 = inlined_call_operand.vmem [shape: f32[8,128], index: 1, kind: input, shape index: {}]   ;;  %s2051_s2 = inlined_call_operand.vmem [shape: f32[8,128], index: 2, kind: input, shape index: {}]   ;;  %s2052_s3 = inlined_call_operand.vmem [shape: bf16[128,512], index: 3, kind: input, shape index: {}]   ;;  %s2053_s4 = inlined_call_operand.vmem [shape: bf16[128,512], index: 4, kind: input, shape index: {}]   ;;  %s2054_s5 = inlined_call_operand.vmem [shape: f32[1,512], index: 5, kind: input, shape index: {}]   ;;  %s2055_s6 = inlined_call_operand.vmem [shape: bf16[16,8,128], index: 6, kind: output, shape index: {0}]   ;;  %s2056_s7 = inlined_call_operand.vmem [shape: f32[8,128], index: 7, kind: output, shape index: {1}]   ;;  %s2057_s8 = inlined_call_operand.vmem [shape: f32[8,128], index: 8, kind: output, shape index: {2}]  }
   0x1 LB: > { %s1575_s28 = sadd.s32 4294967295, %s1518_s27   ;;  %p1119_p0 = scmp.ge.s32.totalorder %s1518_s27, 1  ;;  %s1518_s27 = sphi %s1569_s27, %s19_s27  }
   0x2   : > { %p258_p1 = scmp.lt.s32.totalorder %s1518_s27, 3 }
   0x4   : > { %p259_p2 = pnand %p1119_p0, %p258_p1 }
   0x5   : > { %s1120_s29 = sshll.u32 (!%p259_p2), %s1575_s28, 3  ;;  %p1124_p4 = scmp.ne.s32.totalorder (!%p259_p2), %s1575_s28, 0 }
   0x6   : > { %262 = sbr.rel (%p259_p2) target bundleno = 461 (0x1cd), region = 44  ;;  %p293_p3 = scmp.lt.s32.totalorder (!%p259_p2), %s1120_s29, 15 }
   0xb   : > { %s2059_s29 = smov (!%p293_p3, %s1120_s29), 15  ;;  %307 = sbr.rel (%p1124_p4) target bundleno = 19 (0x13), region = 48 }
   0xc   : > { %s1121_s30 = sshll.u32 %s2059_s29, 2 }
   0xd   : > { %s1583_s11 = scalar_lea.vmem %s2049_s0, %s1121_s30  ;;  %s1588_s14 = scalar_lea.vmem %s2055_s6, %s1121_s30 }
  0x10   : > { %v308_v0 = vld [vmem:[%s2050_s1] sm:$0xff] }
  0x11   : > { %v310_v1 = vld [vmem:[%s2051_s2] sm:$0xff]  ;;  %309 = vst [vmem:[#allocation2] sm:$0xff] %v308_v0 }
  0x12   : > { %311 = vst [vmem:[#allocation3] sm:$0xff] %v310_v1 }
  0x13 PF: > { %v1255_v2 = vld [vmem:[%s2052_s3 + $0xe0] sm:$0xf]  ;;  %v1441_v3 = vld [vmem:[%s2052_s3 + $0xec] sm:$0xf0]  ;;  %v1439_v4 = vld [vmem:[%s2052_s3 + $0xe4] sm:$0xf] }
  0x14   : > { %v1256_v5 = vor.u32 %v1441_v3, %v1255_v2  ;;  %v1257_v6 = vld [vmem:[%s2052_s3 + $0xf0] sm:$0xf0]  ;;  %v1263_v7 = vld [vmem:[%s2052_s3 + $0xe8] sm:$0xf]  ;;  %v1442_v8 = vld [vmem:[%s2052_s3 + $0xf4] sm:$0xf0] }
  0x15   : > { %v1260_v9 = vor.u32 %v1439_v4, %v1257_v6  ;;  %v1264_v10 = vor.u32 %v1442_v8, %v1263_v7  ;;  %v1440_v11 = vld [vmem:[%s2052_s3 + $0xec] sm:$0xf]  ;;  %v1265_v12 = vld [vmem:[%s2052_s3 + $0xf8] sm:$0xf0]  ;;  %v1239_v13 = vld [vmem:[%s2052_s3 + $0xc0] sm:$0xf] }
  0x16   : > { %546 = vmatpush.bf16.msra.mxu0 %v1256_v5  ;;  %v1268_v14 = vor.u32 %v1440_v11, %v1265_v12  ;;  %v1437_v15 = vld [vmem:[%s2052_s3 + $0xcc] sm:$0xf0]  ;;  %v1435_v16 = vld [vmem:[%s2052_s3 + $0xc4] sm:$0xf]  ;;  %v1241_v17 = vld [vmem:[%s2052_s3 + $0xd0] sm:$0xf0] }
  0x17   : > { %575 = vmatpush.bf16.msra.mxu1 %v1260_v9  ;;  %604 = vmatpush.bf16.msra.mxu2 %v1264_v10  ;;  %v1240_v18 = vor.u32 %v1437_v15, %v1239_v13  ;;  %v1244_v19 = vor.u32 %v1435_v16, %v1241_v17  ;;  %v1247_v20 = vld [vmem:[%s2052_s3 + $0xc8] sm:$0xf]  ;;  %v1438_v21 = vld [vmem:[%s2052_s3 + $0xd4] sm:$0xf0]  ;;  %v1436_v22 = vld [vmem:[%s2052_s3 + $0xcc] sm:$0xf] }
  0x18   : > { %633 = vmatpush.bf16.msra.mxu3 %v1268_v14  ;;  %v1248_v23 = vor.u32 %v1438_v21, %v1247_v20  ;;  %v1249_v24 = vld [vmem:[%s2052_s3 + $0xd8] sm:$0xf0]  ;;  %v1223_v25 = vld [vmem:[%s2052_s3 + $0xa0] sm:$0xf]  ;;  %v1433_v26 = vld [vmem:[%s2052_s3 + $0xac] sm:$0xf0] }
  0x19   : > { %v1252_v27 = vor.u32 %v1436_v22, %v1249_v24  ;;  %v1431_v28 = vld [vmem:[%s2052_s3 + $0xa4] sm:$0xf]  ;;  %v1225_v29 = vld [vmem:[%s2052_s3 + $0xb0] sm:$0xf0]  ;;  %v1231_v30 = vld [vmem:[%s2052_s3 + $0xa8] sm:$0xf]  ;;  %v1224_v31 = vor.u32 %v1433_v26, %v1223_v25 }
  0x1a   : > { %547 = vmatpush.bf16.msra.mxu0 %v1240_v18  ;;  %v1434_v32 = vld [vmem:[%s2052_s3 + $0xb4] sm:$0xf0]  ;;  %v1432_v33 = vld [vmem:[%s2052_s3 + $0xac] sm:$0xf]  ;;  %v1233_v34 = vld [vmem:[%s2052_s3 + $0xb8] sm:$0xf0]  ;;  %v1228_v35 = vor.u32 %v1431_v28, %v1225_v29 }
  0x1b   : > { %576 = vmatpush.bf16.msra.mxu1 %v1244_v19  ;;  %605 = vmatpush.bf16.msra.mxu2 %v1248_v23  ;;  %v1232_v36 = vor.u32 %v1434_v32, %v1231_v30  ;;  %v1207_v37 = vld [vmem:[%s2052_s3 + $0x80] sm:$0xf]  ;;  %v1429_v38 = vld [vmem:[%s2052_s3 + $0x8c] sm:$0xf0]  ;;  %v1427_v39 = vld [vmem:[%s2052_s3 + $0x84] sm:$0xf]  ;;  %v1236_v40 = vor.u32 %v1432_v33, %v1233_v34 }
  0x1c   : > { %634 = vmatpush.bf16.msra.mxu3 %v1252_v27  ;;  %v1209_v41 = vld [vmem:[%s2052_s3 + $0x90] sm:$0xf0]  ;;  %v1215_v42 = vld [vmem:[%s2052_s3 + $0x88] sm:$0xf]  ;;  %v1430_v43 = vld [vmem:[%s2052_s3 + $0x94] sm:$0xf0]  ;;  %v1208_v46 = vor.u32 %v1429_v38, %v1207_v37 }
  0x1d   : > { %v1428_v44 = vld [vmem:[%s2052_s3 + $0x8c] sm:$0xf]  ;;  %v1217_v45 = vld [vmem:[%s2052_s3 + $0x98] sm:$0xf0]  ;;  %v1212_v47 = vor.u32 %v1427_v39, %v1209_v41  ;;  %v1216_v48 = vor.u32 %v1430_v43, %v1215_v42  ;;  %v1191_v49 = vld [vmem:[%s2052_s3 + $0x60] sm:$0xf] }
  0x1e   : > { %548 = vmatpush.bf16.msra.mxu0 %v1224_v31  ;;  %v1425_v50 = vld [vmem:[%s2052_s3 + $0x6c] sm:$0xf0]  ;;  %v1423_v51 = vld [vmem:[%s2052_s3 + $0x64] sm:$0xf]  ;;  %v1220_v52 = vor.u32 %v1428_v44, %v1217_v45  ;;  %v1193_v53 = vld [vmem:[%s2052_s3 + $0x70] sm:$0xf0] }
  0x1f   : > { %577 = vmatpush.bf16.msra.mxu1 %v1228_v35  ;;  %606 = vmatpush.bf16.msra.mxu2 %v1232_v36  ;;  %v1199_v54 = vld [vmem:[%s2052_s3 + $0x68] sm:$0xf]  ;;  %v1426_v55 = vld [vmem:[%s2052_s3 + $0x74] sm:$0xf0]  ;;  %v1424_v56 = vld [vmem:[%s2052_s3 + $0x6c] sm:$0xf]  ;;  %v1192_v58 = vor.u32 %v1425_v50, %v1191_v49  ;;  %v1196_v59 = vor.u32 %v1423_v51, %v1193_v53 }
  0x20   : > { %635 = vmatpush.bf16.msra.mxu3 %v1236_v40  ;;  %v1201_v57 = vld [vmem:[%s2052_s3 + $0x78] sm:$0xf0]  ;;  %v1200_v60 = vor.u32 %v1426_v55, %v1199_v54  ;;  %v1175_v61 = vld [vmem:[%s2052_s3 + $0x40] sm:$0xf]  ;;  %v1421_v62 = vld [vmem:[%s2052_s3 + $0x4c] sm:$0xf0] }
  0x21   : > { %v1419_v63 = vld [vmem:[%s2052_s3 + $0x44] sm:$0xf]  ;;  %v1204_v0 = vor.u32 %v1424_v56, %v1201_v57  ;;  %v1177_v1 = vld [vmem:[%s2052_s3 + $0x50] sm:$0xf0]  ;;  %v1183_v2 = vld [vmem:[%s2052_s3 + $0x48] sm:$0xf]  ;;  %v1176_v6 = vor.u32 %v1421_v62, %v1175_v61 }
  0x22   : > { %549 = vmatpush.bf16.msra.mxu0 %v1208_v46  ;;  %v1422_v3 = vld [vmem:[%s2052_s3 + $0x54] sm:$0xf0]  ;;  %v1420_v4 = vld [vmem:[%s2052_s3 + $0x4c] sm:$0xf]  ;;  %v1185_v5 = vld [vmem:[%s2052_s3 + $0x58] sm:$0xf0]  ;;  %v1180_v7 = vor.u32 %v1419_v63, %v1177_v1 }
  0x23   : > { %578 = vmatpush.bf16.msra.mxu1 %v1212_v47  ;;  %607 = vmatpush.bf16.msra.mxu2 %v1216_v48  ;;  %v1184_v8 = vor.u32 %v1422_v3, %v1183_v2  ;;  %v1159_v9 = vld [vmem:[%s2052_s3 + $0x20] sm:$0xf]  ;;  %v1417_v10 = vld [vmem:[%s2052_s3 + $0x2c] sm:$0xf0]  ;;  %v1415_v11 = vld [vmem:[%s2052_s3 + $0x24] sm:$0xf]  ;;  %v1188_v12 = vor.u32 %v1420_v4, %v1185_v5 }
  0x24   : > { %636 = vmatpush.bf16.msra.mxu3 %v1220_v52  ;;  %v1161_v13 = vld [vmem:[%s2052_s3 + $0x30] sm:$0xf0]  ;;  %v1167_v14 = vld [vmem:[%s2052_s3 + $0x28] sm:$0xf]  ;;  %v1418_v15 = vld [vmem:[%s2052_s3 + $0x34] sm:$0xf0]  ;;  %v1160_v18 = vor.u32 %v1417_v10, %v1159_v9 }
  0x25   : > { %v1416_v16 = vld [vmem:[%s2052_s3 + $0x2c] sm:$0xf]  ;;  %v1169_v17 = vld [vmem:[%s2052_s3 + $0x38] sm:$0xf0]  ;;  %v1164_v19 = vor.u32 %v1415_v11, %v1161_v13  ;;  %v1168_v20 = vor.u32 %v1418_v15, %v1167_v14  ;;  %v1143_v21 = vld [vmem:[%s2052_s3] sm:$0xf] }
  0x26   : > { %550 = vmatpush.bf16.msra.mxu0 %v1192_v58  ;;  %v1413_v22 = vld [vmem:[%s2052_s3 + $0xc] sm:$0xf0]  ;;  %v1411_v23 = vld [vmem:[%s2052_s3 + $0x4] sm:$0xf]  ;;  %v1172_v24 = vor.u32 %v1416_v16, %v1169_v17  ;;  %v1145_v25 = vld [vmem:[%s2052_s3 + $0x10] sm:$0xf0] }
  0x27   : > { %579 = vmatpush.bf16.msra.mxu1 %v1196_v59  ;;  %608 = vmatpush.bf16.msra.mxu2 %v1200_v60  ;;  %v1151_v26 = vld [vmem:[%s2052_s3 + $0x8] sm:$0xf]  ;;  %v1414_v27 = vld [vmem:[%s2052_s3 + $0x14] sm:$0xf0]  ;;  %v1412_v28 = vld [vmem:[%s2052_s3 + $0xc] sm:$0xf]  ;;  %v1144_v30 = vor.u32 %v1413_v22, %v1143_v21  ;;  %v1148_v31 = vor.u32 %v1411_v23, %v1145_v25 }
  0x28   : > { %637 = vmatpush.bf16.msra.mxu3 %v1204_v0  ;;  %v1153_v29 = vld [vmem:[%s2052_s3 + $0x18] sm:$0xf0]  ;;  %v1152_v32 = vor.u32 %v1414_v27, %v1151_v26  ;;  %v1407_v34 = vld [vmem:[%s1583_s11] sm:$0xff]  ;;  %v1408_v35 = vld [vmem:[%s1583_s11 + $0x8] sm:$0xff] }
  0x29   : > { %v1156_v33 = vor.u32 %v1412_v28, %v1153_v29  ;;  %v1409_v36 = vld [vmem:[%s1583_s11 + $0x10] sm:$0xff]  ;;  %v1410_v37 = vld [vmem:[%s1583_s11 + $0x18] sm:$0xff]  ;;  %v352_v38 = vld [vmem:[%s2054_s5] sm:$0xf]  ;;  %s1836_s11 = smov 0  }
  0x2a   : > { %551 = vmatpush.bf16.msra.mxu0 %v1176_v6  ;;  %v1796_v39 = vperm.slane %v352_v38, 0  ;;  %v1798_v40 = vperm.slane %v352_v38, 1  ;;  %v1802_v45 = vperm.slane %v352_v38, 2  ;;  %v1804_v46 = vperm.slane %v352_v38, 3 }
  0x2b   : > { %580 = vmatpush.bf16.msra.mxu1 %v1180_v7  ;;  %609 = vmatpush.bf16.msra.mxu2 %v1184_v8 }
  0x2c   : > { %638 = vmatpush.bf16.msra.mxu3 %v1188_v12 }
  0x2e   : > { %552 = vmatpush.bf16.msra.mxu0 %v1160_v18 }
  0x2f   : > { %581 = vmatpush.bf16.msra.mxu1 %v1164_v19  ;;  %610 = vmatpush.bf16.msra.mxu2 %v1168_v20 }
  0x30   : > { %639 = vmatpush.bf16.msra.mxu3 %v1172_v24 }
  0x32   : > { %553 = vmatpush.bf16.msra.mxu0 %v1144_v30 }
  0x33   : > { %582 = vmatpush.bf16.msra.mxu1 %v1148_v31  ;;  %611 = vmatpush.bf16.msra.mxu2 %v1152_v32 }
  0x34   : > { %640 = vmatpush.bf16.msra.mxu3 %v1156_v33 }
  0x35   : > { %554 = vmatmul.bf16.vlgmr.msra.gmra.mxu0 %v1407_v34 }
  0x36   : > { %583 = vmatmul.bf16.vlgmr.msra.gmra.mxu1 %v1407_v34  ;;  %612 = vmatmul.bf16.vlgmr.msra.gmra.mxu2 %v1407_v34 }
  0x37   : > { %641 = vmatmul.bf16.vlgmr.msra.gmra.mxu3 %v1407_v34 }
  0x45   : > { %559 = vmatmul.bf16.gmra.mxu0 %v1408_v35 }
  0x46   : > { %588 = vmatmul.bf16.gmra.mxu1 %v1408_v35  ;;  %617 = vmatmul.bf16.gmra.mxu2 %v1408_v35 }
  0x47   : > { %646 = vmatmul.bf16.gmra.mxu3 %v1408_v35 }
  0x55   : > { %564 = vmatmul.bf16.gmra.mxu0 %v1409_v36 }
  0x56   : > { %593 = vmatmul.bf16.gmra.mxu1 %v1409_v36  ;;  %622 = vmatmul.bf16.gmra.mxu2 %v1409_v36 }
  0x57   : > { %651 = vmatmul.bf16.gmra.mxu3 %v1409_v36 }
  0x65   : > { %569 = vmatmul.bf16.gmra.mxu0 %v1410_v37 }
  0x66   : > { %598 = vmatmul.bf16.gmra.mxu1 %v1410_v37  ;;  %627 = vmatmul.bf16.gmra.mxu2 %v1410_v37 }
  0x67   : > { %656 = vmatmul.bf16.gmra.mxu3 %v1410_v37 }
  0xb2   : > { %v555_v41 = vpop.f32.mrf.mxu0 }
  0xb3   : > { %v556_v42 = vadd.f32 %v555_v41, %v1796_v39  ;;  %v584_v43 = vpop.f32.mrf.mxu1 }
  0xb4   : > { %v585_v44 = vadd.f32 %v584_v43, %v1798_v40 }
  0xb5   : > { %662 = vst [vmem:[#allocation4] sm:$0xff] %v556_v42 }
  0xb6   : > { %663 = vst [vmem:[#allocation4 + $0x8] sm:$0xff] %v585_v44 }
  0xb9   : > { %v613_v47 = vpop.f32.mrf.mxu2 }
  0xba   : > { %v614_v48 = vadd.f32 %v613_v47, %v1802_v45  ;;  %v642_v49 = vpop.f32.mrf.mxu3  ;;  %v557_v50 = vpop.f32.mrf.mxu0 }
  0xbb   : > { %v643_v51 = vadd.f32 %v642_v49, %v1804_v46  ;;  %v558_v52 = vadd.f32 %v557_v50, %v1796_v39  ;;  %v586_v53 = vpop.f32.mrf.mxu1 }
  0xbc   : > { %664 = vst [vmem:[#allocation4 + $0x10] sm:$0xff] %v614_v48  ;;  %v587_v54 = vadd.f32 %v586_v53, %v1798_v40 }
  0xbd   : > { %665 = vst [vmem:[#allocation4 + $0x18] sm:$0xff] %v643_v51 }
  0xbe   : > { %666 = vst [vmem:[#allocation4 + $0x20] sm:$0xff] %v558_v52 }
  0xbf   : > { %667 = vst [vmem:[#allocation4 + $0x28] sm:$0xff] %v587_v54 }
  0xc1   : > { %v615_v55 = vpop.f32.mrf.mxu2 }
  0xc2   : > { %v616_v56 = vadd.f32 %v615_v55, %v1802_v45  ;;  %v644_v57 = vpop.f32.mrf.mxu3  ;;  %v560_v58 = vpop.f32.mrf.mxu0 }
  0xc3   : > { %v645_v59 = vadd.f32 %v644_v57, %v1804_v46  ;;  %v561_v60 = vadd.f32 %v560_v58, %v1796_v39  ;;  %v589_v61 = vpop.f32.mrf.mxu1 }
  0xc4   : > { %668 = vst [vmem:[#allocation4 + $0x30] sm:$0xff] %v616_v56  ;;  %v590_v62 = vadd.f32 %v589_v61, %v1798_v40 }
  0xc5   : > { %669 = vst [vmem:[#allocation4 + $0x38] sm:$0xff] %v645_v59 }
  0xc6   : > { %670 = vst [vmem:[#allocation4 + $0x40] sm:$0xff] %v561_v60 }
  0xc7   : > { %671 = vst [vmem:[#allocation4 + $0x48] sm:$0xff] %v590_v62 }
  0xc9   : > { %v618_v63 = vpop.f32.mrf.mxu2 }
  0xca   : > { %v619_v0 = vadd.f32 %v618_v63, %v1802_v45  ;;  %v647_v1 = vpop.f32.mrf.mxu3  ;;  %v562_v2 = vpop.f32.mrf.mxu0 }
  0xcb   : > { %v648_v3 = vadd.f32 %v647_v1, %v1804_v46  ;;  %v563_v4 = vadd.f32 %v562_v2, %v1796_v39  ;;  %v591_v5 = vpop.f32.mrf.mxu1 }
  0xcc   : > { %672 = vst [vmem:[#allocation4 + $0x50] sm:$0xff] %v619_v0  ;;  %v592_v6 = vadd.f32 %v591_v5, %v1798_v40 }
  0xcd   : > { %673 = vst [vmem:[#allocation4 + $0x58] sm:$0xff] %v648_v3 }
  0xce   : > { %674 = vst [vmem:[#allocation4 + $0x60] sm:$0xff] %v563_v4 }
  0xcf   : > { %675 = vst [vmem:[#allocation4 + $0x68] sm:$0xff] %v592_v6 }
  0xd1   : > { %v620_v7 = vpop.f32.mrf.mxu2 }
  0xd2   : > { %v621_v8 = vadd.f32 %v620_v7, %v1802_v45  ;;  %v649_v9 = vpop.f32.mrf.mxu3  ;;  %v565_v10 = vpop.f32.mrf.mxu0 }
  0xd3   : > { %v650_v11 = vadd.f32 %v649_v9, %v1804_v46  ;;  %v566_v12 = vadd.f32 %v565_v10, %v1796_v39  ;;  %v594_v13 = vpop.f32.mrf.mxu1 }
  0xd4   : > { %676 = vst [vmem:[#allocation4 + $0x70] sm:$0xff] %v621_v8  ;;  %v595_v14 = vadd.f32 %v594_v13, %v1798_v40 }
  0xd5   : > { %677 = vst [vmem:[#allocation4 + $0x78] sm:$0xff] %v650_v11 }
  0xd6   : > { %678 = vst [vmem:[#allocation4 + $0x80] sm:$0xff] %v566_v12 }
  0xd7   : > { %679 = vst [vmem:[#allocation4 + $0x88] sm:$0xff] %v595_v14 }
  0xd9   : > { %v623_v15 = vpop.f32.mrf.mxu2 }
  0xda   : > { %v624_v16 = vadd.f32 %v623_v15, %v1802_v45  ;;  %v652_v17 = vpop.f32.mrf.mxu3  ;;  %v567_v18 = vpop.f32.mrf.mxu0 }
  0xdb   : > { %v653_v19 = vadd.f32 %v652_v17, %v1804_v46  ;;  %v568_v20 = vadd.f32 %v567_v18, %v1796_v39  ;;  %v596_v21 = vpop.f32.mrf.mxu1 }
  0xdc   : > { %680 = vst [vmem:[#allocation4 + $0x90] sm:$0xff] %v624_v16  ;;  %v597_v22 = vadd.f32 %v596_v21, %v1798_v40 }
  0xdd   : > { %681 = vst [vmem:[#allocation4 + $0x98] sm:$0xff] %v653_v19 }
  0xde   : > { %682 = vst [vmem:[#allocation4 + $0xa0] sm:$0xff] %v568_v20 }
  0xdf   : > { %683 = vst [vmem:[#allocation4 + $0xa8] sm:$0xff] %v597_v22 }
  0xe1   : > { %v625_v23 = vpop.f32.mrf.mxu2 }
  0xe2   : > { %v626_v24 = vadd.f32 %v625_v23, %v1802_v45  ;;  %v654_v25 = vpop.f32.mrf.mxu3  ;;  %v570_v26 = vpop.f32.mrf.mxu0 }
  0xe3   : > { %v655_v27 = vadd.f32 %v654_v25, %v1804_v46  ;;  %v571_v28 = vadd.f32 %v570_v26, %v1796_v39  ;;  %v599_v29 = vpop.f32.mrf.mxu1 }
  0xe4   : > { %684 = vst [vmem:[#allocation4 + $0xb0] sm:$0xff] %v626_v24  ;;  %v600_v30 = vadd.f32 %v599_v29, %v1798_v40 }
  0xe5   : > { %685 = vst [vmem:[#allocation4 + $0xb8] sm:$0xff] %v655_v27 }
  0xe6   : > { %686 = vst [vmem:[#allocation4 + $0xc0] sm:$0xff] %v571_v28 }
  0xe7   : > { %687 = vst [vmem:[#allocation4 + $0xc8] sm:$0xff] %v600_v30 }
  0xe9   : > { %v628_v31 = vpop.f32.mrf.mxu2 }
  0xea   : > { %v629_v32 = vadd.f32 %v628_v31, %v1802_v45  ;;  %v657_v33 = vpop.f32.mrf.mxu3  ;;  %v572_v34 = vpop.f32.mrf.mxu0 }
  0xeb   : > { %v658_v35 = vadd.f32 %v657_v33, %v1804_v46  ;;  %v573_v36 = vadd.f32 %v572_v34, %v1796_v39  ;;  %v601_v37 = vpop.f32.mrf.mxu1 }
  0xec   : > { %688 = vst [vmem:[#allocation4 + $0xd0] sm:$0xff] %v629_v32  ;;  %v602_v38 = vadd.f32 %v601_v37, %v1798_v40 }
  0xed   : > { %689 = vst [vmem:[#allocation4 + $0xd8] sm:$0xff] %v658_v35 }
  0xee   : > { %690 = vst [vmem:[#allocation4 + $0xe0] sm:$0xff] %v573_v36 }
  0xef   : > { %691 = vst [vmem:[#allocation4 + $0xe8] sm:$0xff] %v602_v38 }
  0xf1   : > { %v630_v41 = vpop.f32.mrf.mxu2 }
  0xf2   : > { %v631_v42 = vadd.f32 %v630_v41, %v1802_v45  ;;  %v659_v43 = vpop.f32.mrf.mxu3 }
  0xf3   : > { %v660_v44 = vadd.f32 %v659_v43, %v1804_v46 }
  0xf4   : > { %692 = vst [vmem:[#allocation4 + $0xf0] sm:$0xff] %v631_v42 }
  0xf5   : > { %693 = vst [vmem:[#allocation4 + $0xf8] sm:$0xff] %v660_v44 }
  0xf6 LB: >> { %v1386_v39 = vld [vmem:[%s2053_s4 + $0xe0] sm:$0xf]  ;;  %v1474_v40 = vld [vmem:[%s2053_s4 + $0xec] sm:$0xf0]  ;;  %v1472_v45 = vld [vmem:[%s2053_s4 + $0xe4] sm:$0xf]  ;;  %s1522_s11 = sphi %s1836_s11, %s699_s11  }
  0xf7   : >> { %v1387_v46 = vor.u32 %v1474_v40, %v1386_v39  ;;  %v1388_v47 = vld [vmem:[%s2053_s4 + $0xf0] sm:$0xf0]  ;;  %v1473_v48 = vld [vmem:[%s2053_s4 + $0xec] sm:$0xf]  ;;  %v1396_v49 = vld [vmem:[%s2053_s4 + $0xf8] sm:$0xf0] }
  0xf8   : >> { %v1391_v50 = vor.u32 %v1472_v45, %v1388_v47  ;;  %v1399_v51 = vor.u32 %v1473_v48, %v1396_v49  ;;  %v1370_v52 = vld [vmem:[%s2053_s4 + $0xc0] sm:$0xf]  ;;  %v1470_v53 = vld [vmem:[%s2053_s4 + $0xcc] sm:$0xf0]  ;;  %v1468_v54 = vld [vmem:[%s2053_s4 + $0xc4] sm:$0xf] }
  0xf9   : >> { %905 = vmatpush.bf16.msra.mxu0 %v1387_v46  ;;  %v1371_v55 = vor.u32 %v1470_v53, %v1370_v52  ;;  %v1372_v56 = vld [vmem:[%s2053_s4 + $0xd0] sm:$0xf0]  ;;  %v1469_v57 = vld [vmem:[%s2053_s4 + $0xcc] sm:$0xf]  ;;  %v1380_v58 = vld [vmem:[%s2053_s4 + $0xd8] sm:$0xf0] }
  0xfa   : >> { %918 = vmatpush.bf16.msra.mxu1 %v1391_v50  ;;  %944 = vmatpush.bf16.msra.mxu3 %v1399_v51  ;;  %v1375_v59 = vor.u32 %v1468_v54, %v1372_v56  ;;  %v1383_v60 = vor.u32 %v1469_v57, %v1380_v58  ;;  %v1394_v61 = vld [vmem:[%s2053_s4 + $0xe8] sm:$0xf]  ;;  %v1475_v62 = vld [vmem:[%s2053_s4 + $0xf4] sm:$0xf0]  ;;  %v1354_v63 = vld [vmem:[%s2053_s4 + $0xa0] sm:$0xf] }
  0xfb   : >> { %v1395_v0 = vor.u32 %v1475_v62, %v1394_v61  ;;  %v1466_v1 = vld [vmem:[%s2053_s4 + $0xac] sm:$0xf0]  ;;  %v1464_v2 = vld [vmem:[%s2053_s4 + $0xa4] sm:$0xf]  ;;  %v1356_v3 = vld [vmem:[%s2053_s4 + $0xb0] sm:$0xf0] }
  0xfc   : >> { %v1465_v4 = vld [vmem:[%s2053_s4 + $0xac] sm:$0xf]  ;;  %v1364_v5 = vld [vmem:[%s2053_s4 + $0xb8] sm:$0xf0]  ;;  %v1378_v6 = vld [vmem:[%s2053_s4 + $0xc8] sm:$0xf]  ;;  %v1355_v7 = vor.u32 %v1466_v1, %v1354_v63  ;;  %v1359_v11 = vor.u32 %v1464_v2, %v1356_v3 }
  0xfd   : >> { %906 = vmatpush.bf16.msra.mxu0 %v1371_v55  ;;  %931 = vmatpush.bf16.msra.mxu2 %v1395_v0  ;;  %v1471_v8 = vld [vmem:[%s2053_s4 + $0xd4] sm:$0xf0]  ;;  %v1338_v9 = vld [vmem:[%s2053_s4 + $0x80] sm:$0xf]  ;;  %v1462_v10 = vld [vmem:[%s2053_s4 + $0x8c] sm:$0xf0]  ;;  %v1367_v12 = vor.u32 %v1465_v4, %v1364_v5 }
  0xfe   : >> { %919 = vmatpush.bf16.msra.mxu1 %v1375_v59  ;;  %945 = vmatpush.bf16.msra.mxu3 %v1383_v60  ;;  %v1379_v13 = vor.u32 %v1471_v8, %v1378_v6  ;;  %v1460_v14 = vld [vmem:[%s2053_s4 + $0x84] sm:$0xf]  ;;  %v1340_v15 = vld [vmem:[%s2053_s4 + $0x90] sm:$0xf0]  ;;  %v1461_v16 = vld [vmem:[%s2053_s4 + $0x8c] sm:$0xf]  ;;  %v1339_v20 = vor.u32 %v1462_v10, %v1338_v9 }
  0xff   : >> { %v1348_v17 = vld [vmem:[%s2053_s4 + $0x98] sm:$0xf0]  ;;  %v1362_v18 = vld [vmem:[%s2053_s4 + $0xa8] sm:$0xf]  ;;  %v1467_v19 = vld [vmem:[%s2053_s4 + $0xb4] sm:$0xf0]  ;;  %v1343_v24 = vor.u32 %v1460_v14, %v1340_v15 }
 0x100   : >> { %v1363_v21 = vor.u32 %v1467_v19, %v1362_v18  ;;  %v1322_v22 = vld [vmem:[%s2053_s4 + $0x60] sm:$0xf]  ;;  %v1458_v23 = vld [vmem:[%s2053_s4 + $0x6c] sm:$0xf0]  ;;  %v1351_v25 = vor.u32 %v1461_v16, %v1348_v17  ;;  %v1456_v26 = vld [vmem:[%s2053_s4 + $0x64] sm:$0xf] }
 0x101   : >> { %907 = vmatpush.bf16.msra.mxu0 %v1355_v7  ;;  %932 = vmatpush.bf16.msra.mxu2 %v1379_v13  ;;  %v1346_v27 = vld [vmem:[%s2053_s4 + $0x88] sm:$0xf]  ;;  %v1463_v28 = vld [vmem:[%s2053_s4 + $0x94] sm:$0xf0]  ;;  %v1324_v29 = vld [vmem:[%s2053_s4 + $0x70] sm:$0xf0]  ;;  %v1323_v32 = vor.u32 %v1458_v23, %v1322_v22 }
 0x102   : >> { %920 = vmatpush.bf16.msra.mxu1 %v1359_v11  ;;  %946 = vmatpush.bf16.msra.mxu3 %v1367_v12  ;;  %v1457_v30 = vld [vmem:[%s2053_s4 + $0x6c] sm:$0xf]  ;;  %v1332_v31 = vld [vmem:[%s2053_s4 + $0x78] sm:$0xf0]  ;;  %v1347_v33 = vor.u32 %v1463_v28, %v1346_v27  ;;  %v1306_v34 = vld [vmem:[%s2053_s4 + $0x40] sm:$0xf]  ;;  %v1327_v36 = vor.u32 %v1456_v26, %v1324_v29 }
 0x103   : >> { %v1454_v35 = vld [vmem:[%s2053_s4 + $0x4c] sm:$0xf0]  ;;  %v1335_v37 = vor.u32 %v1457_v30, %v1332_v31  ;;  %v1452_v38 = vld [vmem:[%s2053_s4 + $0x44] sm:$0xf]  ;;  %v1330_v41 = vld [vmem:[%s2053_s4 + $0x68] sm:$0xf] }
 0x104   : >> { %v1459_v42 = vld [vmem:[%s2053_s4 + $0x74] sm:$0xf0]  ;;  %v1308_v43 = vld [vmem:[%s2053_s4 + $0x50] sm:$0xf0]  ;;  %v1453_v44 = vld [vmem:[%s2053_s4 + $0x4c] sm:$0xf]  ;;  %v1307_v40 = vor.u32 %v1454_v35, %v1306_v34 }
 0x105   : >> { %908 = vmatpush.bf16.msra.mxu0 %v1339_v20  ;;  %933 = vmatpush.bf16.msra.mxu2 %v1363_v21  ;;  %v1316_v39 = vld [vmem:[%s2053_s4 + $0x58] sm:$0xf0]  ;;  %v1331_v45 = vor.u32 %v1459_v42, %v1330_v41  ;;  %v1290_v46 = vld [vmem:[%s2053_s4 + $0x20] sm:$0xf]  ;;  %v1450_v47 = vld [vmem:[%s2053_s4 + $0x2c] sm:$0xf0]  ;;  %v1311_v48 = vor.u32 %v1452_v38, %v1308_v43 }
 0x106   : >> { %921 = vmatpush.bf16.msra.mxu1 %v1343_v24  ;;  %947 = vmatpush.bf16.msra.mxu3 %v1351_v25  ;;  %v1319_v49 = vor.u32 %v1453_v44, %v1316_v39  ;;  %v1448_v50 = vld [vmem:[%s2053_s4 + $0x24] sm:$0xf]  ;;  %v1314_v51 = vld [vmem:[%s2053_s4 + $0x48] sm:$0xf]  ;;  %v1455_v52 = vld [vmem:[%s2053_s4 + $0x54] sm:$0xf0]  ;;  %v1291_v56 = vor.u32 %v1450_v47, %v1290_v46 }
 0x107   : >> { %v1292_v53 = vld [vmem:[%s2053_s4 + $0x30] sm:$0xf0]  ;;  %v1449_v54 = vld [vmem:[%s2053_s4 + $0x2c] sm:$0xf]  ;;  %v1300_v55 = vld [vmem:[%s2053_s4 + $0x38] sm:$0xf0]  ;;  %v1315_v57 = vor.u32 %v1455_v52, %v1314_v51 }
 0x108   : >> { %v1274_v58 = vld [vmem:[%s2053_s4] sm:$0xf]  ;;  %v1446_v59 = vld [vmem:[%s2053_s4 + $0xc] sm:$0xf0]  ;;  %v1295_v60 = vor.u32 %v1448_v50, %v1292_v53  ;;  %v1303_v61 = vor.u32 %v1449_v54, %v1300_v55  ;;  %v1444_v62 = vld [vmem:[%s2053_s4 + $0x4] sm:$0xf] }
 0x109   : >> { %909 = vmatpush.bf16.msra.mxu0 %v1323_v32  ;;  %934 = vmatpush.bf16.msra.mxu2 %v1347_v33  ;;  %v1298_v63 = vld [vmem:[%s2053_s4 + $0x28] sm:$0xf]  ;;  %v1451_v0 = vld [vmem:[%s2053_s4 + $0x34] sm:$0xf0]  ;;  %v1276_v1 = vld [vmem:[%s2053_s4 + $0x10] sm:$0xf0]  ;;  %v1275_v4 = vor.u32 %v1446_v59, %v1274_v58 }
 0x10a   : >> { %922 = vmatpush.bf16.msra.mxu1 %v1327_v36  ;;  %948 = vmatpush.bf16.msra.mxu3 %v1335_v37  ;;  %v1445_v2 = vld [vmem:[%s2053_s4 + $0xc] sm:$0xf]  ;;  %v1284_v3 = vld [vmem:[%s2053_s4 + $0x18] sm:$0xf0]  ;;  %v700_v5 = vld [vmem:[#allocation2] sm:$0xff]  ;;  %v1299_v6 = vor.u32 %v1451_v0, %v1298_v63  ;;  %v1279_v7 = vor.u32 %v1444_v62, %v1276_v1  ;;  %s1269_s25 = sshll.u32 %s1522_s11, 3 }
 0x10b   : >> { %v1287_v8 = vor.u32 %v1445_v2, %v1284_v3  ;;  %v1282_v9 = vld [vmem:[%s2053_s4 + $0x8] sm:$0xf]  ;;  %v1447_v10 = vld [vmem:[%s2053_s4 + $0x14] sm:$0xf0]  ;;  %v712_v11 = vpack.c.bf16 %v700_v5, %v700_v5  ;;  %s703_s26 = sshra.s32 %s1269_s25, 3  ;;  %s1403_s9 = sshll.u32 %s1522_s11, 2 }
 0x10c   : >> { %v1283_v12 = vor.u32 %v1447_v10, %v1282_v9  ;;  %s1443_s29 = sshll.u32 %s703_s26, 5  ;;  %s1028_s10 = scalar_lea.vmem %s1588_s14, %s1403_s9 }
 0x10d   : >> { %910 = vmatpush.bf16.msra.mxu0 %v1307_v40  ;;  %935 = vmatpush.bf16.msra.mxu2 %v1331_v45  ;;  %s707_s30 = scalar_lea.vmem [#allocation4], %s1443_s29  ;;  %s699_s11 = sadd.s32 1, %s1522_s11  }
 0x10e   : >> { %923 = vmatpush.bf16.msra.mxu1 %v1311_v48  ;;  %949 = vmatpush.bf16.msra.mxu3 %v1319_v49  ;;  %v708_v13 = vld [vmem:[%s707_s30] sm:$0xff]  ;;  %v709_v14 = vld [vmem:[%s707_s30 + $0x8] sm:$0xff]  ;;  %v711_v21 = vld [vmem:[%s707_s30 + $0x18] sm:$0xff]  ;;  %p696_p5 = scmp.ge.s32.totalorder %s699_s11, 8  }
 0x10f   : >> { %v710_v32 = vld [vmem:[%s707_s30 + $0x10] sm:$0xff]  ;;  %p1404_p6 = scmp.ne.s32.totalorder (%p696_p5), %s1575_s28, 1 }
 0x111   : >> { %911 = vmatpush.bf16.msra.mxu0 %v1291_v56  ;;  %936 = vmatpush.bf16.msra.mxu2 %v1315_v57  ;;  %v701_v57 = vld [vmem:[#allocation3] sm:$0xff] }
 0x112   : >> { %924 = vmatpush.bf16.msra.mxu1 %v1295_v60  ;;  %950 = vmatpush.bf16.msra.mxu3 %v1303_v61 }
 0x115   : >> { %912 = vmatpush.bf16.msra.mxu0 %v1275_v4  ;;  %937 = vmatpush.bf16.msra.mxu2 %v1299_v6 }
 0x116   : >> { %925 = vmatpush.bf16.msra.mxu1 %v1279_v7  ;;  %951 = vmatpush.bf16.msra.mxu3 %v1287_v8 }
 0x118   : >> { %913 = vmatmul.bf16.vlgmr.msra.gmra.mxu0 %v712_v11 }
 0x119   : >> { %926 = vmatmul.bf16.vlgmr.msra.gmra.mxu1 %v712_v11  ;;  %952 = vmatmul.bf16.vlgmr.msra.gmra.mxu3 %v712_v11 }
 0x11a   : >> { %938 = vmatpush.bf16.msra.mxu2 %v1283_v12 }
 0x11d   : >> { %939 = vmatmul.bf16.vlgmr.msra.gmra.mxu2 %v712_v11 }
 0x195   : >> { %v914_v15 = vpop.f32.mrf.mxu0 }
 0x196   : >> { %v957_v16 = vadd.f32 %v914_v15, %v708_v13  ;;  %v927_v17 = vpop.f32.mrf.mxu1 }
 0x197   : >> { %v958_v18 = vadd.f32 %v927_v17, %v709_v14 }
 0x198   : >> { %v1400_v19 = vmul.f32 -1.442695, %v957_v16 }
 0x199   : >> { %v1401_v20 = vmul.f32 -1.442695, %v958_v18 }
 0x19a   : >> { %1492 = vpow2.f32 %v1400_v19 }
 0x19b   : >> { %1494 = vpow2.f32 %v1401_v20 }
 0x19c   : >> { %v953_v22 = vpop.f32.mrf.mxu3 }
 0x19d   : >> { %v960_v23 = vadd.f32 %v953_v22, %v711_v21  ;;  %v916_v24 = vpop.f32.mrf.mxu0 }
 0x19e   : >> { %v929_v25 = vpop.f32.mrf.mxu1 }
 0x19f   : >> { %v1402_v26 = vmul.f32 -1.442695, %v960_v23 }
 0x1a0   : >> { %v1493_v27 = vpop.eup %1492  ;;  %v940_v28 = vpop.f32.mrf.mxu2 }
 0x1a1   : >> { %v1495_v29 = vpop.eup %1494  ;;  %v964_v30 = vadd.f32 1.0, %v1493_v27  ;;  %1496 = vpow2.f32 %v1402_v26  ;;  %v959_v35 = vadd.f32 %v940_v28, %v710_v32 }
 0x1a2   : >> { %v983_v31 = vadd.f32 1.0, %v1495_v29 }
 0x1a3   : >> { %1498 = vrcp.f32 %v964_v30  ;;  %v976_v40 = vand.u32 2147483648, %v964_v30  ;;  %v974_v47 = vand.u32 2147483647, %v964_v30  ;;  %vm970_vm2 = vweird.f32 %v964_v30 }
 0x1a4   : >> { %1500 = vrcp.f32 %v983_v31  ;;  %v955_v33 = vpop.f32.mrf.mxu3  ;;  %v995_v45 = vand.u32 2147483648, %v983_v31  ;;  %v993_v49 = vand.u32 2147483647, %v983_v31  ;;  %vm989_vm3 = vweird.f32 %v983_v31 }
 0x1a5   : >> { %v977_v54 = vor.u32 1.1754944e-38, %v976_v40  ;;  %vm975_vm6 = vcmp.eq.f32.partialorder %v974_v47, 8.507059e+37 }
 0x1a6   : >> { %v996_v56 = vor.u32 1.1754944e-38, %v995_v45  ;;  %vm994_vm7 = vcmp.eq.f32.partialorder %v993_v49, 8.507059e+37 }
 0x1a7   : >> { %v1497_v34 = vpop.eup %1496 }
 0x1a8   : >> { %v1003_v36 = vadd.f32 1.0, %v1497_v34  ;;  %v942_v37 = vpop.f32.mrf.mxu2 }
 0x1a9   : >> { %v1499_v38 = vpop.eup %1498 }
 0x1aa   : >> { %v1501_v41 = vpop.eup %1500  ;;  %v966_v42 = vmul.f32 %v1499_v38, %v964_v30  ;;  %1502 = vrcp.f32 %v1003_v36  ;;  %vm971_vm0 = vweird.f32 %v1499_v38  ;;  %v1015_v4 = vand.u32 2147483648, %v1003_v36 }
 0x1ab   : >> { %v985_v43 = vmul.f32 %v1501_v41, %v983_v31  ;;  %1504 = vtanh.f32 %v959_v35  ;;  %vm990_vm1 = vweird.f32 %v1501_v41  ;;  %vm972_vm4 = vmor %vm970_vm2, %vm971_vm0  ;;  %vm1009_vm9 = vweird.f32 %v1003_v36 }
 0x1ac   : >> { %v967_v44 = vsub.f32 1.0, %v966_v42  ;;  %vm991_vm5 = vmor %vm989_vm3, %vm990_vm1  ;;  %v1013_v5 = vand.u32 2147483647, %v1003_v36  ;;  %v1016_v7 = vor.u32 1.1754944e-38, %v1015_v4 }
 0x1ad   : >> { %v986_v39 = vsub.f32 1.0, %v985_v43 }
 0x1ae   : >> { %v968_v46 = vmul.f32 %v1499_v38, %v967_v44  ;;  %vm1014_vm11 = vcmp.eq.f32.partialorder %v1013_v5, 8.507059e+37 }
 0x1af   : >> { %v987_v48 = vmul.f32 %v1501_v41, %v986_v39 }
 0x1b0   : >> { %v1503_v50 = vpop.eup %1502  ;;  %v969_v51 = vadd.f32 %v1499_v38, %v968_v46 }
 0x1b1   : >> { %v1505_v52 = vpop.eup %1504  ;;  %v1005_v53 = vmul.f32 %v1503_v50, %v1003_v36  ;;  %v988_v55 = vadd.f32 %v1501_v41, %v987_v48  ;;  %vm1010_vm8 = vweird.f32 %v1503_v50 }
 0x1b2   : >> { %v973_v58 = vsel %vm972_vm4, %v1499_v38, %v969_v51  ;;  %vm1011_vm10 = vmor %vm1009_vm9, %vm1010_vm8 }
 0x1b3   : >> { %v1006_v59 = vsub.f32 1.0, %v1005_v53  ;;  %v978_v60 = vsel %vm975_vm6, %v977_v54, %v973_v58  ;;  %v992_v61 = vsel %vm991_vm5, %v1501_v41, %v988_v55 }
 0x1b4   : >> { %v997_v62 = vsel %vm994_vm7, %v996_v56, %v992_v61  ;;  %v1020_v63 = vmul.f32 %v1505_v52, %v978_v60 }
 0x1b5   : >> { %v1007_v0 = vmul.f32 %v1503_v50, %v1006_v59  ;;  %v1019_v1 = vmul.f32 %v997_v62, %v701_v57 }
 0x1b7   : >> { %v1021_v2 = vadd.f32 %v1020_v63, %v1019_v1  ;;  %v1008_v3 = vadd.f32 %v1503_v50, %v1007_v0 }
 0x1b9   : >> { %1506 = vtanh.f32 %v1021_v2  ;;  %1025 = vst [vmem:[#allocation3] sm:$0xff] %v1021_v2  ;;  %v1012_v6 = vsel %vm1011_vm10, %v1503_v50, %v1008_v3 }
 0x1ba   : >> { %v1017_v9 = vsel %vm1014_vm11, %v1016_v7, %v1012_v6 }
 0x1bf   : >> { %v1507_v8 = vpop.eup %1506 }
 0x1c0   : >> { %v1023_v10 = vmul.f32 %v1507_v8, %v1017_v9  ;;  %698 = sbr.rel (!%p696_p5) target bundleno = 246 (0xf6), region = 107 }
 0x1c2   : >> { %1024 = vst [vmem:[#allocation2] sm:$0xff] %v1023_v10  ;;  %v1026_v11 = vpack.c.bf16 %v1023_v10, %v1023_v10 }
 0x1c4   : >> { %1029 = vst [vmem:[%s1028_s10] sm:$0xf] %v1026_v11 }
 0x1c5   : > { %1033 = sbr.rel (%p1404_p6) target bundleno = 461 (0x1cd), region = 59 }
 0x1ca   : > { %v1034_v12 = vld [vmem:[#allocation2] sm:$0xff]  ;;  %v1036_v13 = vld [vmem:[#allocation3] sm:$0xff] }
 0x1cb   : > { %1035 = vst [vmem:[%s2056_s7] sm:$0xff] %v1034_v12 }
 0x1cc   : > { %1037 = vst [vmem:[%s2057_s8] sm:$0xff] %v1036_v13 }
 0x1cd PF: > { %s19_s27 = sadd.s32 1, %s1518_s27  }
 0x1ce   : > { %p16_p7 = scmp.ge.s32.totalorder %s19_s27, 4  }
 0x1d0   :  { %18 = sbr.rel (!%p16_p7) target bundleno = 1 (0x1), region = 118 }

// kernel: rnnlm_forward.5
= control target key start
LH: loop header
LB: loop body
LE: loop exit
PB: predicated region body
PF: predicated region fallthrough
CT: control target
= control target key end

     0   :  { %s679_s0 = inlined_call_operand.vmem [shape: bf16[128,128], index: 0, kind: input, shape index: {}]   ;;  %s680_s1 = inlined_call_operand.vmem [shape: bf16[128,256], index: 1, kind: input, shape index: {}]   ;;  %s681_s2 = inlined_call_operand.vmem [shape: f32[1,256], index: 2, kind: input, shape index: {}]   ;;  %s682_s3 = inlined_call_operand.hbm [shape: f32[128,256], index: 3, kind: output, shape index: {}]  }
   0x1   :  { %v419_v0 = vld [vmem:[%s680_s1 + $0x70] sm:$0xf]  ;;  %v448_v1 = vld [vmem:[%s680_s1 + $0x74] sm:$0xf0]  ;;  %v447_v2 = vld [vmem:[%s680_s1 + $0x74] sm:$0xf] }
   0x2   :  { %v420_v3 = vor.u32 %v448_v1, %v419_v0  ;;  %v421_v4 = vld [vmem:[%s680_s1 + $0x78] sm:$0xf0]  ;;  %v411_v5 = vld [vmem:[%s680_s1 + $0x60] sm:$0xf]  ;;  %v446_v6 = vld [vmem:[%s680_s1 + $0x64] sm:$0xf0] }
   0x3   :  { %v424_v7 = vor.u32 %v447_v2, %v421_v4  ;;  %v445_v8 = vld [vmem:[%s680_s1 + $0x64] sm:$0xf]  ;;  %v413_v9 = vld [vmem:[%s680_s1 + $0x68] sm:$0xf0]  ;;  %v412_v10 = vor.u32 %v446_v6, %v411_v5  ;;  %v403_v12 = vld [vmem:[%s680_s1 + $0x50] sm:$0xf] }
   0x4   :  { %181 = vmatpush.bf16.msra.mxu0 %v420_v3  ;;  %449 = vmatpush.bf16.msra.mxu2 %v420_v3  ;;  %v416_v11 = vor.u32 %v445_v8, %v413_v9  ;;  %v444_v13 = vld [vmem:[%s680_s1 + $0x54] sm:$0xf0]  ;;  %v443_v14 = vld [vmem:[%s680_s1 + $0x54] sm:$0xf]  ;;  %v405_v15 = vld [vmem:[%s680_s1 + $0x58] sm:$0xf0] }
   0x5   :  { %230 = vmatpush.bf16.msra.mxu1 %v424_v7  ;;  %457 = vmatpush.bf16.msra.mxu3 %v424_v7  ;;  %v404_v16 = vor.u32 %v444_v13, %v403_v12  ;;  %v408_v17 = vor.u32 %v443_v14, %v405_v15  ;;  %v395_v18 = vld [vmem:[%s680_s1 + $0x40] sm:$0xf]  ;;  %v442_v19 = vld [vmem:[%s680_s1 + $0x44] sm:$0xf0]  ;;  %v441_v20 = vld [vmem:[%s680_s1 + $0x44] sm:$0xf] }
   0x6   :  { %v397_v21 = vld [vmem:[%s680_s1 + $0x48] sm:$0xf0]  ;;  %v396_v22 = vor.u32 %v442_v19, %v395_v18 }
   0x8   :  { %182 = vmatpush.bf16.msra.mxu0 %v412_v10  ;;  %450 = vmatpush.bf16.msra.mxu2 %v412_v10 }
   0x9   :  { %231 = vmatpush.bf16.msra.mxu1 %v416_v11  ;;  %458 = vmatpush.bf16.msra.mxu3 %v416_v11 }
   0xc   :  { %183 = vmatpush.bf16.msra.mxu0 %v404_v16  ;;  %451 = vmatpush.bf16.msra.mxu2 %v404_v16 }
   0xd   :  { %8 = vsyncpa [#allocation3], 0  ;;  %232 = vmatpush.bf16.msra.mxu1 %v408_v17  ;;  %459 = vmatpush.bf16.msra.mxu3 %v408_v17  ;;  %v400_v23 = vor.u32 %v441_v20, %v397_v21  ;;  %v387_v24 = vld [vmem:[%s680_s1 + $0x30] sm:$0xf]  ;;  %v440_v25 = vld [vmem:[%s680_s1 + $0x34] sm:$0xf0] }
   0xe   :  { %v439_v26 = vld [vmem:[%s680_s1 + $0x34] sm:$0xf]  ;;  %v389_v27 = vld [vmem:[%s680_s1 + $0x38] sm:$0xf0]  ;;  %v388_v28 = vor.u32 %v440_v25, %v387_v24  ;;  %v379_v30 = vld [vmem:[%s680_s1 + $0x20] sm:$0xf] }
   0xf   :  { %v392_v29 = vor.u32 %v439_v26, %v389_v27  ;;  %v438_v31 = vld [vmem:[%s680_s1 + $0x24] sm:$0xf0]  ;;  %v437_v32 = vld [vmem:[%s680_s1 + $0x24] sm:$0xf]  ;;  %v381_v33 = vld [vmem:[%s680_s1 + $0x28] sm:$0xf0] }
  0x10   :  { %184 = vmatpush.bf16.msra.mxu0 %v396_v22  ;;  %452 = vmatpush.bf16.msra.mxu2 %v396_v22  ;;  %v380_v34 = vor.u32 %v438_v31, %v379_v30  ;;  %v384_v35 = vor.u32 %v437_v32, %v381_v33  ;;  %v371_v36 = vld [vmem:[%s680_s1 + $0x10] sm:$0xf]  ;;  %v436_v37 = vld [vmem:[%s680_s1 + $0x14] sm:$0xf0]  ;;  %v435_v38 = vld [vmem:[%s680_s1 + $0x14] sm:$0xf] }
  0x11   :  { %233 = vmatpush.bf16.msra.mxu1 %v400_v23  ;;  %460 = vmatpush.bf16.msra.mxu3 %v400_v23  ;;  %v373_v39 = vld [vmem:[%s680_s1 + $0x18] sm:$0xf0]  ;;  %v372_v40 = vor.u32 %v436_v37, %v371_v36  ;;  %v363_v42 = vld [vmem:[%s680_s1] sm:$0xf]  ;;  %v434_v43 = vld [vmem:[%s680_s1 + $0x4] sm:$0xf0] }
  0x12   :  { %v376_v41 = vor.u32 %v435_v38, %v373_v39  ;;  %v433_v44 = vld [vmem:[%s680_s1 + $0x4] sm:$0xf]  ;;  %v365_v45 = vld [vmem:[%s680_s1 + $0x8] sm:$0xf0]  ;;  %v364_v46 = vor.u32 %v434_v43, %v363_v42  ;;  %v427_v52 = vld [vmem:[%s679_s0 + $0x10] sm:$0xff]  ;;  %s317_s14 = sshll.u32 %s682_s3, 4  ;;  %s318_s14 = int_to_ptr.hbm [resolvable:$true] %s317_s14 }
  0x13   :  { %v368_v47 = vor.u32 %v433_v44, %v365_v45  ;;  %v425_v48 = vld [vmem:[%s679_s0] sm:$0xff]  ;;  %v426_v50 = vld [vmem:[%s679_s0 + $0x8] sm:$0xff]  ;;  %v431_v53 = vld [vmem:[%s679_s0 + $0x30] sm:$0xff]  ;;  %s495_s15 = smov 256   ;;  %s496_s16 = smov 16  }
  0x14   :  { %185 = vmatpush.bf16.msra.mxu0 %v388_v28  ;;  %453 = vmatpush.bf16.msra.mxu2 %v388_v28  ;;  %v429_v49 = vld [vmem:[%s679_s0 + $0x20] sm:$0xff]  ;;  %v430_v51 = vld [vmem:[%s679_s0 + $0x28] sm:$0xff]  ;;  %v428_v54 = vld [vmem:[%s679_s0 + $0x18] sm:$0xff] }
  0x15   :  { %234 = vmatpush.bf16.msra.mxu1 %v392_v29  ;;  %461 = vmatpush.bf16.msra.mxu3 %v392_v29  ;;  %v432_v55 = vld [vmem:[%s679_s0 + $0x38] sm:$0xff]  ;;  %v47_v56 = vld [vmem:[%s681_s2] sm:$0x3]  ;;  %s494_s0 = smov [#allocation2]  }
  0x16   :  { %v640_v57 = vperm.slane %v47_v56, 0  ;;  %v642_v58 = vperm.slane %v47_v56, 1  ;;  %s315_s2 = sshll.u32 %s494_s0, 4  ;;  %s316_s2 = int_to_ptr.vmem [resolvable:$true] %s315_s2 }
  0x18   :  { %186 = vmatpush.bf16.msra.mxu0 %v380_v34  ;;  %454 = vmatpush.bf16.msra.mxu2 %v380_v34 }
  0x19   :  { %235 = vmatpush.bf16.msra.mxu1 %v384_v35  ;;  %462 = vmatpush.bf16.msra.mxu3 %v384_v35 }
  0x1c   :  { %187 = vmatpush.bf16.msra.mxu0 %v372_v40  ;;  %455 = vmatpush.bf16.msra.mxu2 %v372_v40 }
  0x1d   :  { %236 = vmatpush.bf16.msra.mxu1 %v376_v41  ;;  %463 = vmatpush.bf16.msra.mxu3 %v376_v41 }
  0x20   :  { %188 = vmatpush.bf16.msra.mxu0 %v364_v46  ;;  %456 = vmatpush.bf16.msra.mxu2 %v364_v46 }
  0x21   :  { %237 = vmatpush.bf16.msra.mxu1 %v368_v47  ;;  %464 = vmatpush.bf16.msra.mxu3 %v368_v47 }
  0x23   :  { %189 = vmatmul.bf16.vlgmr.msra.gmra.mxu0 %v425_v48  ;;  %209 = vmatmul.bf16.vlgmr.msra.gmra.mxu2 %v429_v49 }
  0x24   :  { %238 = vmatmul.bf16.vlgmr.msra.gmra.mxu1 %v425_v48  ;;  %258 = vmatmul.bf16.vlgmr.msra.gmra.mxu3 %v429_v49 }
  0x33   :  { %194 = vmatmul.bf16.gmra.mxu0 %v426_v50  ;;  %214 = vmatmul.bf16.gmra.mxu2 %v430_v51 }
  0x34   :  { %243 = vmatmul.bf16.gmra.mxu1 %v426_v50  ;;  %263 = vmatmul.bf16.gmra.mxu3 %v430_v51 }
  0x43   :  { %199 = vmatmul.bf16.gmra.mxu0 %v427_v52  ;;  %219 = vmatmul.bf16.gmra.mxu2 %v431_v53 }
  0x44   :  { %248 = vmatmul.bf16.gmra.mxu1 %v427_v52  ;;  %268 = vmatmul.bf16.gmra.mxu3 %v431_v53 }
  0x53   :  { %204 = vmatmul.bf16.gmra.mxu0 %v428_v54  ;;  %224 = vmatmul.bf16.gmra.mxu2 %v432_v55 }
  0x54   :  { %253 = vmatmul.bf16.gmra.mxu1 %v428_v54  ;;  %273 = vmatmul.bf16.gmra.mxu3 %v432_v55 }
  0xa0   :  { %v190_v59 = vpop.f32.mrf.mxu0 }
  0xa1   :  { %v191_v60 = vadd.f32 %v190_v59, %v640_v57  ;;  %v239_v61 = vpop.f32.mrf.mxu1 }
  0xa2   :  { %v240_v62 = vadd.f32 %v239_v61, %v642_v58 }
  0xa3   :  { %279 = vst [vmem:[#allocation2] sm:$0xff] %v191_v60 }
  0xa4   :  { %280 = vst [vmem:[#allocation2 + $0x8] sm:$0xff] %v240_v62 }
  0xa6   :  { %v210_v63 = vpop.f32.mrf.mxu2 }
  0xa7   :  { %v211_v0 = vadd.f32 %v210_v63, %v640_v57  ;;  %v259_v1 = vpop.f32.mrf.mxu3 }
  0xa8   :  { %v260_v2 = vadd.f32 %v259_v1, %v642_v58  ;;  %v192_v3 = vpop.f32.mrf.mxu0 }
  0xa9   :  { %295 = vst [vmem:[#allocation2 + $0x80] sm:$0xff] %v211_v0  ;;  %v193_v4 = vadd.f32 %v192_v3, %v640_v57  ;;  %v241_v5 = vpop.f32.mrf.mxu1 }
  0xaa   :  { %296 = vst [vmem:[#allocation2 + $0x88] sm:$0xff] %v260_v2  ;;  %v242_v6 = vadd.f32 %v241_v5, %v642_v58 }
  0xab   :  { %281 = vst [vmem:[#allocation2 + $0x10] sm:$0xff] %v193_v4 }
  0xac   :  { %282 = vst [vmem:[#allocation2 + $0x18] sm:$0xff] %v242_v6 }
  0xae   :  { %v212_v7 = vpop.f32.mrf.mxu2 }
  0xaf   :  { %v213_v8 = vadd.f32 %v212_v7, %v640_v57  ;;  %v261_v9 = vpop.f32.mrf.mxu3 }
  0xb0   :  { %v262_v10 = vadd.f32 %v261_v9, %v642_v58  ;;  %v195_v11 = vpop.f32.mrf.mxu0 }
  0xb1   :  { %297 = vst [vmem:[#allocation2 + $0x90] sm:$0xff] %v213_v8  ;;  %v196_v12 = vadd.f32 %v195_v11, %v640_v57  ;;  %v244_v13 = vpop.f32.mrf.mxu1 }
  0xb2   :  { %298 = vst [vmem:[#allocation2 + $0x98] sm:$0xff] %v262_v10  ;;  %v245_v14 = vadd.f32 %v244_v13, %v642_v58 }
  0xb3   :  { %283 = vst [vmem:[#allocation2 + $0x20] sm:$0xff] %v196_v12 }
  0xb4   :  { %284 = vst [vmem:[#allocation2 + $0x28] sm:$0xff] %v245_v14 }
  0xb6   :  { %v215_v15 = vpop.f32.mrf.mxu2 }
  0xb7   :  { %v216_v16 = vadd.f32 %v215_v15, %v640_v57  ;;  %v264_v17 = vpop.f32.mrf.mxu3 }
  0xb8   :  { %v265_v18 = vadd.f32 %v264_v17, %v642_v58  ;;  %v197_v19 = vpop.f32.mrf.mxu0 }
  0xb9   :  { %299 = vst [vmem:[#allocation2 + $0xa0] sm:$0xff] %v216_v16  ;;  %v198_v20 = vadd.f32 %v197_v19, %v640_v57  ;;  %v246_v21 = vpop.f32.mrf.mxu1 }
  0xba   :  { %300 = vst [vmem:[#allocation2 + $0xa8] sm:$0xff] %v265_v18  ;;  %v247_v22 = vadd.f32 %v246_v21, %v642_v58 }
  0xbb   :  { %285 = vst [vmem:[#allocation2 + $0x30] sm:$0xff] %v198_v20 }
  0xbc   :  { %286 = vst [vmem:[#allocation2 + $0x38] sm:$0xff] %v247_v22 }
  0xbe   :  { %v217_v23 = vpop.f32.mrf.mxu2 }
  0xbf   :  { %v218_v24 = vadd.f32 %v217_v23, %v640_v57  ;;  %v266_v25 = vpop.f32.mrf.mxu3 }
  0xc0   :  { %v267_v26 = vadd.f32 %v266_v25, %v642_v58  ;;  %v200_v27 = vpop.f32.mrf.mxu0 }
  0xc1   :  { %301 = vst [vmem:[#allocation2 + $0xb0] sm:$0xff] %v218_v24  ;;  %v201_v28 = vadd.f32 %v200_v27, %v640_v57  ;;  %v249_v29 = vpop.f32.mrf.mxu1 }
  0xc2   :  { %302 = vst [vmem:[#allocation2 + $0xb8] sm:$0xff] %v267_v26  ;;  %v250_v30 = vadd.f32 %v249_v29, %v642_v58 }
  0xc3   :  { %287 = vst [vmem:[#allocation2 + $0x40] sm:$0xff] %v201_v28 }
  0xc4   :  { %288 = vst [vmem:[#allocation2 + $0x48] sm:$0xff] %v250_v30 }
  0xc6   :  { %v220_v31 = vpop.f32.mrf.mxu2 }
  0xc7   :  { %v221_v32 = vadd.f32 %v220_v31, %v640_v57  ;;  %v269_v33 = vpop.f32.mrf.mxu3 }
  0xc8   :  { %v270_v34 = vadd.f32 %v269_v33, %v642_v58  ;;  %v202_v35 = vpop.f32.mrf.mxu0 }
  0xc9   :  { %303 = vst [vmem:[#allocation2 + $0xc0] sm:$0xff] %v221_v32  ;;  %v203_v36 = vadd.f32 %v202_v35, %v640_v57  ;;  %v251_v37 = vpop.f32.mrf.mxu1 }
  0xca   :  { %304 = vst [vmem:[#allocation2 + $0xc8] sm:$0xff] %v270_v34  ;;  %v252_v38 = vadd.f32 %v251_v37, %v642_v58 }
  0xcb   :  { %289 = vst [vmem:[#allocation2 + $0x50] sm:$0xff] %v203_v36 }
  0xcc   :  { %290 = vst [vmem:[#allocation2 + $0x58] sm:$0xff] %v252_v38 }
  0xce   :  { %v222_v39 = vpop.f32.mrf.mxu2 }
  0xcf   :  { %v223_v40 = vadd.f32 %v222_v39, %v640_v57  ;;  %v271_v41 = vpop.f32.mrf.mxu3 }
  0xd0   :  { %v272_v42 = vadd.f32 %v271_v41, %v642_v58  ;;  %v205_v43 = vpop.f32.mrf.mxu0 }
  0xd1   :  { %305 = vst [vmem:[#allocation2 + $0xd0] sm:$0xff] %v223_v40  ;;  %v206_v44 = vadd.f32 %v205_v43, %v640_v57  ;;  %v254_v45 = vpop.f32.mrf.mxu1 }
  0xd2   :  { %306 = vst [vmem:[#allocation2 + $0xd8] sm:$0xff] %v272_v42  ;;  %v255_v46 = vadd.f32 %v254_v45, %v642_v58 }
  0xd3   :  { %291 = vst [vmem:[#allocation2 + $0x60] sm:$0xff] %v206_v44 }
  0xd4   :  { %292 = vst [vmem:[#allocation2 + $0x68] sm:$0xff] %v255_v46 }
  0xd6   :  { %v225_v47 = vpop.f32.mrf.mxu2 }
  0xd7   :  { %v226_v48 = vadd.f32 %v225_v47, %v640_v57  ;;  %v274_v49 = vpop.f32.mrf.mxu3 }
  0xd8   :  { %v275_v50 = vadd.f32 %v274_v49, %v642_v58  ;;  %v207_v51 = vpop.f32.mrf.mxu0 }
  0xd9   :  { %307 = vst [vmem:[#allocation2 + $0xe0] sm:$0xff] %v226_v48  ;;  %v208_v52 = vadd.f32 %v207_v51, %v640_v57  ;;  %v256_v53 = vpop.f32.mrf.mxu1 }
  0xda   :  { %308 = vst [vmem:[#allocation2 + $0xe8] sm:$0xff] %v275_v50  ;;  %v257_v54 = vadd.f32 %v256_v53, %v642_v58 }
  0xdb   :  { %293 = vst [vmem:[#allocation2 + $0x70] sm:$0xff] %v208_v52 }
  0xdc   :  { %294 = vst [vmem:[#allocation2 + $0x78] sm:$0xff] %v257_v54 }
  0xde   :  { %v227_v55 = vpop.f32.mrf.mxu2 }
  0xdf   :  { %v228_v56 = vadd.f32 %v227_v55, %v640_v57  ;;  %v276_v59 = vpop.f32.mrf.mxu3 }
  0xe0   :  { %v277_v60 = vadd.f32 %v276_v59, %v642_v58 }
  0xe1   :  { %309 = vst [vmem:[#allocation2 + $0xf0] sm:$0xff] %v228_v56 }
  0xe2   :  { %310 = vst [vmem:[#allocation2 + $0xf8] sm:$0xff] %v277_v60 }
  0xe3   :  { %323 = dma.vmem_to_hbm [thread:$0]  %s316_s2, 4096, %s318_s14, [#allocation3], %s495_s15, %s495_s15, %s496_s16  }
  0xe4   :  { %492 = dma.done.wait [#allocation3], 4096  }
  0xe5   :  { %493 = vsyncadd [#allocation3], 4294963200 }
  0xe6   :  { %328 = vsyncpa [#allocation3], 1 }

</bundles_post_ra>
